<compile_context>
chip_gen: v7x
topology: tpu7x:2x2x1
jax: 0.10.0
libtpu: 0.0.40
codegen_flags: <defaults>
</compile_context>

<pallas_src>
import math
import functools

import jax
import jax.numpy as jnp
from jax import lax
from jax.experimental import pallas as pl
from jax.experimental.pallas import tpu as pltpu


def _round_up(x, m):
    return ((x + m - 1) // m) * m


def _layer_norm(x, w, b, eps=1e-5):
    mu = jnp.mean(x, axis=-1, keepdims=True)
    xc = x - mu
    var = jnp.mean(xc * xc, axis=-1, keepdims=True)
    return xc * lax.rsqrt(var + eps) * w + b


def _gelu_exact(x):
    # nn.TransformerEncoderLayer(activation='gelu') uses exact erf-GELU.
    return 0.5 * x * (1.0 + lax.erf(x * (1.0 / math.sqrt(2.0))))


def _tf_encoder_kernel(
    x_ref, wp_ref, add_ref, wqkv_ref, wo_ref, w1_ref, w2_ref, vec_ref,
    o_ref, resid_ref, *, num_heads: int, seq_valid: int,
):
    layer = pl.program_id(1)
    n_layers = pl.num_programs(1)

    f32 = jnp.float32
    cdt = jnp.bfloat16                                   # MXU operand dtype

    bb, tp, fea = x_ref.shape
    d_model = add_ref.shape[1]
    ff = w1_ref.shape[2]
    m = bb * tp
    head_dim = d_model // num_heads
    scale = 1.0 / math.sqrt(head_dim)

    # ---- layer-0 prologue: input projection + cls token + position embedding.
    # add_ref folds proj bias, cls token and pos embeddings; the cls/pad rows
    # of x are zero so one matmul covers all Tp rows.
    @pl.when(layer == 0)
    def _():
        xin = x_ref[...].reshape(m, fea).astype(cdt)
        proj = jnp.dot(xin, wp_ref[...], preferred_element_type=f32)     # [M, D]
        proj = proj.reshape(bb, tp, d_model) + add_ref[...][None]
        resid_ref[...] = proj.reshape(m, d_model)

    # Residual stream stays VMEM-resident in f32 scratch across layers.
    x = resid_ref[...]                                                   # [M, D]

    # Packed per-layer vectors (f32): rows are
    # 0 bqkv | 1 bo | 2 ln1w | 3 ln1b | 4 b1 | 5 b2 | 6 ln2w | 7 ln2b
    vec = vec_ref[0]
    b_qkv = vec[0:1, :3 * d_model]
    b_o = vec[1:2, :d_model]
    ln1w, ln1b = vec[2:3, :d_model], vec[3:4, :d_model]
    b_1 = vec[4:5, :ff]
    b_2 = vec[5:6, :d_model]
    ln2w, ln2b = vec[6:7, :d_model], vec[7:8, :d_model]

    # ---- multi-head self-attention (post-norm; dropout = identity / eval).
    qkv = jnp.dot(x.astype(cdt), wqkv_ref[0], preferred_element_type=f32) + b_qkv
    q = qkv[:, 0:d_model]
    k = qkv[:, d_model:2 * d_model]
    v = qkv[:, 2 * d_model:3 * d_model]

    if tp > seq_valid:
        # Padded key columns -> very negative score before softmax.
        col = lax.broadcasted_iota(jnp.int32, (1, 1, tp), 2)
        key_bias = jnp.where(col < seq_valid, 0.0, -1e30).astype(f32)
    else:
        key_bias = None

    ctx_parts = []
    for h in range(num_heads):                                           # static unroll
        sl = slice(h * head_dim, (h + 1) * head_dim)
        qh = q[:, sl].reshape(bb, tp, head_dim).astype(cdt)
        kh = k[:, sl].reshape(bb, tp, head_dim).astype(cdt)
        vh = v[:, sl].reshape(bb, tp, head_dim).astype(cdt)
        s = jnp.einsum("bqd,bkd->bqk", qh, kh,
                       preferred_element_type=f32) * scale               # [Bb, T, T]
        if key_bias is not None:
            s = s + key_bias
        s = s - jnp.max(s, axis=-1, keepdims=True)
        p = jnp.exp(s)
        denom = jnp.sum(p, axis=-1, keepdims=True)
        inv = pl.reciprocal(denom, approx=True)      # EUP slot
        inv = inv * (2.0 - denom * inv)              # one Newton step -> near exact
        p = p * inv
        ctx_h = jnp.einsum("bqk,bkd->bqd", p.astype(cdt), vh,
                           preferred_element_type=f32)                   # [Bb, T, hd]
        ctx_parts.append(ctx_h.reshape(m, head_dim))

    # Single K=D output projection on the concatenated heads (one fused matmul
    # instead of H small-K matmuls).
    ctx = jnp.concatenate(ctx_parts, axis=-1)                            # [M, D]
    attn = jnp.dot(ctx.astype(cdt), wo_ref[0], preferred_element_type=f32) + b_o

    x = _layer_norm(x + attn, ln1w, ln1b)

    # ---- feed-forward: Linear -> exact GELU -> Linear (dropout = identity).
    h1 = jnp.dot(x.astype(cdt), w1_ref[0], preferred_element_type=f32) + b_1
    h1 = _gelu_exact(h1)
    h2 = jnp.dot(h1.astype(cdt), w2_ref[0], preferred_element_type=f32) + b_2

    x = _layer_norm(x + h2, ln2w, ln2b)

    resid_ref[...] = x

    @pl.when(layer == n_layers - 1)
    def _():
        o_ref[...] = x.reshape(bb, tp, d_model).astype(o_ref.dtype)


def _pick_block_b(batch):
    # Largest batch block that still leaves >= 2 parallel grid steps (v7x
    # megacore); otherwise 1.
    for bb in (8, 4, 2):
        if batch % bb == 0 and batch // bb >= 2:
            return bb
    return 1


def tf_encoder_forward(params, src, *, num_heads, src_key_padding_mask=None,
                       block_b=None):
    """Pallas forward of TfEncoder: src [B, S, fea] -> [B, S+1, d_model]."""
    # TODO(synk): src_key_padding_mask (additive -inf key masking) not implemented.
    assert src_key_padding_mask is None
    # TODO(synk): dropout is identity (eval-mode); training would use pltpu.prng_*.

    B, S, F = src.shape
    D = params["wp"].shape[1]
    FF = params["w1"].shape[2]
    L = params["wqkv"].shape[0]
    H = num_heads
    T = S + 1
    assert D % H == 0 and D % 128 == 0 and FF % 128 == 0

    # Pad the sequence so [T, *] tiles are sublane/lane friendly (e.g. 501->512
    # at production size); padded keys are masked in the kernel.
    Tp = _round_up(T, 8) if T <= 128 else _round_up(T, 128)

    Bb = block_b if block_b is not None else _pick_block_b(B)
    assert B % Bb == 0

    f32 = jnp.float32
    src = src.astype(f32)

    # Zero row in the cls slot + zero pad rows -> one matmul covers all Tp rows.
    x_pad = jnp.zeros((B, Tp, F), f32).at[:, 1:T, :].set(src)

    # Fold proj bias, cls token and position embeddings into ONE additive
    # [Tp, D] term (hoisted once; never re-broadcast per grid step).
    bp = params["bp"].astype(f32).reshape(1, D)
    cls = params["cls"].astype(f32).reshape(1, D)
    pos = params["pos"].astype(f32).reshape(T, D)
    add_core = pos + jnp.concatenate([cls, jnp.broadcast_to(bp, (S, D))], axis=0)
    add_vec = jnp.zeros((Tp, D), f32).at[:T, :].set(add_core)

    # Pack the 8 small per-layer vectors into one [L, 8, Vmax] array
    # (1 DMA + 1 double-buffer per layer instead of 8).
    Vmax = max(3 * D, FF)

    def _row(a):
        a2 = a.reshape(L, -1).astype(f32)
        return jnp.pad(a2, ((0, 0), (0, Vmax - a2.shape[1])))

    vecs = jnp.stack([_row(params["bqkv"]), _row(params["bo"]),
                      _row(params["ln1w"]), _row(params["ln1b"]),
                      _row(params["b1"]), _row(params["b2"]),
                      _row(params["ln2w"]), _row(params["ln2b"])], axis=1)

    wdt = jnp.bfloat16
    wp = params["wp"].astype(wdt)
    wqkv = params["wqkv"].astype(wdt)
    wo = params["wo"].astype(wdt)
    w1 = params["w1"].astype(wdt)
    w2 = params["w2"].astype(wdt)

    # VMEM budget: double-buffered streamed blocks + resident activations,
    # clamped to this chip's physical VMEM (v5e/v6e 128 MiB, v7x 64 MiB).
    # TODO(synk): at production sizes on v7x, w1/w2 should additionally be tiled
    # over an FF grid axis (or pltpu.emit_pipeline) for extra headroom.
    wbytes = 2
    per_layer = (D * 3 * D + D * D + 2 * D * FF) * wbytes + 8 * Vmax * 4
    est = (2 * per_layer                      # layer-streamed weights (dbl-buffered)
           + 2 * Bb * Tp * F * 4              # x block
           + 2 * Tp * D * 4                   # additive term
           + 2 * F * D * wbytes               # proj weight
           + 2 * Bb * Tp * D * 4              # output block
           + Bb * Tp * D * 4                  # f32 residual scratch
           + Bb * Tp * (4 * D + FF) * 4)      # in-kernel temporaries (qkv, h1, ...)
    try:
        cap = int(getattr(pltpu.get_tpu_info(), "vmem_capacity_bytes", 64 << 20))
    except Exception:
        cap = 64 << 20
    vmem_limit = int(min(cap - (8 << 20), max(int(est * 1.5), 32 << 20)))

    kernel = functools.partial(_tf_encoder_kernel, num_heads=H, seq_valid=T)

    out = pl.pallas_call(
        kernel,
        out_shape=jax.ShapeDtypeStruct((B, Tp, D), src.dtype),
        grid_spec=pltpu.PrefetchScalarGridSpec(
            num_scalar_prefetch=0,
            grid=(B // Bb, L),     # batch parallel (megacore), layer arbitrary
            in_specs=[
                pl.BlockSpec((Bb, Tp, F), lambda b, l: (b, 0, 0)),    # padded src
                pl.BlockSpec((F, D), lambda b, l: (0, 0)),            # proj weight
                pl.BlockSpec((Tp, D), lambda b, l: (0, 0)),           # cls/pos/bias
                pl.BlockSpec((1, D, 3 * D), lambda b, l: (l, 0, 0)),  # wqkv
                pl.BlockSpec((1, D, D), lambda b, l: (l, 0, 0)),      # wo
                pl.BlockSpec((1, D, FF), lambda b, l: (l, 0, 0)),     # w1
                pl.BlockSpec((1, FF, D), lambda b, l: (l, 0, 0)),     # w2
                pl.BlockSpec((1, 8, Vmax), lambda b, l: (l, 0, 0)),   # packed vectors
            ],
            out_specs=pl.BlockSpec((Bb, Tp, D), lambda b, l: (b, 0, 0)),
            scratch_shapes=[pltpu.VMEM((Bb * Tp, D), jnp.float32)],   # f32 residual
        ),
        compiler_params=pltpu.CompilerParams(
            dimension_semantics=("parallel", "arbitrary"),
            vmem_limit_bytes=vmem_limit,
        ),
    )(x_pad, wp, add_vec, wqkv, wo, w1, w2, vecs)

    return out[:, :T, :]


def init_params(key, fea_size, d_model, dim_ff, num_layers, seq_plus_one):
    ks = jax.random.split(key, 11)

    def uniform(k, shape, fan_in):
        bound = 1.0 / math.sqrt(fan_in)
        return jax.random.uniform(k, shape, jnp.float32, -bound, bound)

    wdt = jnp.bfloat16   # matmul weights are stored / streamed in bf16
    return dict(
        wp=uniform(ks[0], (fea_size, d_model), fea_size).astype(wdt),
        bp=uniform(ks[1], (1, d_model), fea_size),
        cls=jnp.ones((1, d_model), jnp.float32),       # torch.ones init
        # PyTorch inits position embeddings to zeros (learnable); small random
        # values here exercise the embedding-add path in the correctness check.
        pos=0.02 * jax.random.normal(ks[2], (seq_plus_one, d_model), jnp.float32),
        wqkv=uniform(ks[3], (num_layers, d_model, 3 * d_model), d_model).astype(wdt),
        bqkv=uniform(ks[4], (num_layers, 1, 3 * d_model), d_model),
        wo=uniform(ks[5], (num_layers, d_model, d_model), d_model).astype(wdt),
        bo=uniform(ks[6], (num_layers, 1, d_model), d_model),
        ln1w=jnp.ones((num_layers, 1, d_model), jnp.float32),
        ln1b=jnp.zeros((num_layers, 1, d_model), jnp.float32),
        w1=uniform(ks[7], (num_layers, d_model, dim_ff), d_model).astype(wdt),
        b1=uniform(ks[8], (num_layers, 1, dim_ff), d_model),
        w2=uniform(ks[9], (num_layers, dim_ff, d_model), dim_ff).astype(wdt),
        b2=uniform(ks[10], (num_layers, 1, d_model), dim_ff),
        ln2w=jnp.ones((num_layers, 1, d_model), jnp.float32),
        ln2b=jnp.zeros((num_layers, 1, d_model), jnp.float32),
    )


def _reference_forward(params, src, *, num_heads):
    """Pure-JAX reference (post-norm nn.TransformerEncoder forward, eval mode).

    Matmul operands are cast to bf16 with f32 accumulation — the same compute
    dtype the kernel uses — so the comparison isolates kernel correctness.
    """
    cdt = jnp.bfloat16
    f32 = jnp.float32
    B, S, _ = src.shape
    D = params["wp"].shape[1]
    L = params["wqkv"].shape[0]
    H = num_heads
    hd = D // H
    scale = 1.0 / math.sqrt(hd)

    y = jnp.einsum("bsf,fd->bsd", src.astype(cdt), params["wp"].astype(cdt),
                   preferred_element_type=f32) + params["bp"].astype(f32)
    cls = jnp.broadcast_to(params["cls"].astype(f32).reshape(1, 1, D), (B, 1, D))
    y = jnp.concatenate([cls, y], axis=1) + params["pos"].astype(f32)[None]

    for l in range(L):
        qkv = jnp.einsum("btd,de->bte", y.astype(cdt), params["wqkv"][l].astype(cdt),
                         preferred_element_type=f32) + params["bqkv"][l].astype(f32)
        q, k, v = qkv[..., :D], qkv[..., D:2 * D], qkv[..., 2 * D:]
        ctx = []
        for h in range(H):
            sl = slice(h * hd, (h + 1) * hd)
            s = jnp.einsum("bqd,bkd->bqk", q[..., sl].astype(cdt),
                           k[..., sl].astype(cdt),
                           preferred_element_type=f32) * scale
            p = jax.nn.softmax(s, axis=-1)
            ctx.append(jnp.einsum("bqk,bkd->bqd", p.astype(cdt),
                                  v[..., sl].astype(cdt),
                                  preferred_element_type=f32))
        ctx = jnp.concatenate(ctx, axis=-1)
        attn = jnp.einsum("btd,de->bte", ctx.astype(cdt), params["wo"][l].astype(cdt),
                          preferred_element_type=f32) + params["bo"][l].astype(f32)
        y = _layer_norm(y + attn, params["ln1w"][l].astype(f32),
                        params["ln1b"][l].astype(f32))

        h1 = jnp.einsum("btd,df->btf", y.astype(cdt), params["w1"][l].astype(cdt),
                        preferred_element_type=f32) + params["b1"][l].astype(f32)
        h1 = _gelu_exact(h1)
        h2 = jnp.einsum("btf,fd->btd", h1.astype(cdt), params["w2"][l].astype(cdt),
                        preferred_element_type=f32) + params["b2"][l].astype(f32)
        y = _layer_norm(y + h2, params["ln2w"][l].astype(f32),
                        params["ln2b"][l].astype(f32))
    return y


if __name__ == "__main__":
    key = jax.random.PRNGKey(0)
    k_params, k_x = jax.random.split(key)

    # Small demo shapes consistent with the module (fea_size=20 as in
    # PositionEncodingTraining; production would be S=500 patches, d_model=768,
    # nhead=12, dim_feedforward=3072).  d_model / dim_feedforward are multiples
    # of 128 for lane-dense tiles; S is chosen so T=S+1 exercises the
    # sequence-padding + key-masking path, and batch=4 exercises batch blocking.
    batch, num_patches, fea_size = 4, 13, 20
    d_model, nhead, dim_ff, num_layers = 128, 4, 256, 2
    seq_total = num_patches + 1   # + cls token

    params = init_params(k_params, fea_size, d_model, dim_ff, num_layers, seq_total)
    src = jax.random.normal(k_x, (batch, num_patches, fea_size), jnp.float32)

    out = tf_encoder_forward(params, src, num_heads=nhead)
    out = jax.block_until_ready(out)

    ref = _reference_forward(params, src, num_heads=nhead)
    assert out.shape == (batch, seq_total, d_model), out.shape
    max_err = float(jnp.max(jnp.abs(out - ref)))
    assert jnp.allclose(out, ref, atol=3e-3, rtol=3e-3), f"mismatch vs reference: {max_err}"

    print("KERNEL_OK")
</pallas_src>

<mosaic_0001>
module attributes {stable_mosaic.version = 11 : i64} {
  func.func @_tf_encoder_kernel(%arg0: i32, %arg1: i32, %arg2: memref<2x16x20xf32, #tpu.memory_space<vmem>>, %arg3: memref<20x128xbf16, #tpu.memory_space<vmem>>, %arg4: memref<16x128xf32, #tpu.memory_space<vmem>>, %arg5: memref<1x128x384xbf16, #tpu.memory_space<vmem>>, %arg6: memref<1x128x128xbf16, #tpu.memory_space<vmem>>, %arg7: memref<1x128x256xbf16, #tpu.memory_space<vmem>>, %arg8: memref<1x256x128xbf16, #tpu.memory_space<vmem>>, %arg9: memref<1x8x384xf32, #tpu.memory_space<vmem>>, %arg10: memref<2x16x128xf32, #tpu.memory_space<vmem>>, %arg11: memref<32x128xf32, #tpu.memory_space<vmem>>) attributes {dimension_semantics = [#tpu.dimension_semantics<parallel>, #tpu.dimension_semantics<arbitrary>], iteration_bounds = array<i64: 2, 2>, scalar_prefetch = 0 : i64, scratch_operands = 1 : i64, tpu.core_type = #tpu.core_type<tc>, window_params = [{transform_indices = @transform_0, window_bounds = array<i64: 2, 16, 20>}, {pipeline_mode = #tpu.pipeline_mode<synchronous>, transform_indices = @transform_1, window_bounds = array<i64: 20, 128>}, {pipeline_mode = #tpu.pipeline_mode<synchronous>, transform_indices = @transform_2, window_bounds = array<i64: 16, 128>}, {transform_indices = @transform_3, window_bounds = array<i64: 1, 128, 384>}, {transform_indices = @transform_4, window_bounds = array<i64: 1, 128, 128>}, {transform_indices = @transform_5, window_bounds = array<i64: 1, 128, 256>}, {transform_indices = @transform_6, window_bounds = array<i64: 1, 256, 128>}, {transform_indices = @transform_7, window_bounds = array<i64: 1, 8, 384>}, {transform_indices = @transform_8, window_bounds = array<i64: 2, 16, 128>}]} {
    %c0_i32 = arith.constant 0 : i32
    %0 = arith.cmpi eq, %arg1, %c0_i32 : i32
    %1 = arith.extui %0 : i1 to i32
    %c0_i32_0 = arith.constant 0 : i32
    %2 = arith.cmpi ne, %1, %c0_i32_0 : i32
    scf.if %2 {
      %c0_62 = arith.constant 0 : index
      %c0_63 = arith.constant 0 : index
      %c0_64 = arith.constant 0 : index
      %226 = vector.load %arg2[%c0_62, %c0_63, %c0_64] : memref<2x16x20xf32, #tpu.memory_space<vmem>>, vector<2x16x20xf32>
      %227 = vector.shape_cast %226 : vector<2x16x20xf32> to vector<32x20xf32>
      %228 = arith.truncf %227 : vector<32x20xf32> to vector<32x20xbf16>
      %c0_65 = arith.constant 0 : index
      %c0_66 = arith.constant 0 : index
      %229 = vector.load %arg3[%c0_65, %c0_66] : memref<20x128xbf16, #tpu.memory_space<vmem>>, vector<20x128xbf16>
      %cst_67 = arith.constant dense<0.000000e+00> : vector<32x128xf32>
      %230 = tpu.matmul %228, %229, %cst_67 {dimension_numbers = #tpu.dot_dimension_numbers<[1], [0], [0], [1], [0, 0, 1, 1], [], []>} : vector<32x20xbf16>, vector<20x128xbf16>, vector<32x128xf32> -> vector<32x128xf32>
      %231 = vector.shape_cast %230 : vector<32x128xf32> to vector<2x16x128xf32>
      %c0_68 = arith.constant 0 : index
      %c0_69 = arith.constant 0 : index
      %232 = vector.load %arg4[%c0_68, %c0_69] : memref<16x128xf32, #tpu.memory_space<vmem>>, vector<16x128xf32>
      %233 = vector.shape_cast %232 : vector<16x128xf32> to vector<1x16x128xf32>
      %234 = vector.broadcast %233 : vector<1x16x128xf32> to vector<2x16x128xf32>
      %235 = arith.addf %231, %234 : vector<2x16x128xf32>
      %236 = vector.shape_cast %235 : vector<2x16x128xf32> to vector<32x128xf32>
      %c0_70 = arith.constant 0 : index
      %c0_71 = arith.constant 0 : index
      %237 = vector.load %arg11[%c0_70, %c0_71] : memref<32x128xf32, #tpu.memory_space<vmem>>, vector<32x128xf32>
      tpu.vector_store %arg11[%c0_70, %c0_71], %236 {strides = array<i32>} : memref<32x128xf32, #tpu.memory_space<vmem>>, vector<32x128xf32>,
    } else {
    }
    %c0 = arith.constant 0 : index
    %c0_1 = arith.constant 0 : index
    %3 = vector.load %arg11[%c0, %c0_1] : memref<32x128xf32, #tpu.memory_space<vmem>>, vector<32x128xf32>
    %c0_2 = arith.constant 0 : index
    %c0_3 = arith.constant 0 : index
    %c0_4 = arith.constant 0 : index
    %4 = vector.load %arg9[%c0_2, %c0_3, %c0_4] : memref<1x8x384xf32, #tpu.memory_space<vmem>>, vector<1x8x384xf32>
    %5 = vector.shape_cast %4 : vector<1x8x384xf32> to vector<8x384xf32>
    %6 = vector.extract_strided_slice %5 {offsets = [0, 0], sizes = [1, 384], strides = [1, 1]} : vector<8x384xf32> to vector<1x384xf32>
    %7 = vector.extract_strided_slice %5 {offsets = [1, 0], sizes = [1, 128], strides = [1, 1]} : vector<8x384xf32> to vector<1x128xf32>
    %8 = vector.extract_strided_slice %5 {offsets = [2, 0], sizes = [1, 128], strides = [1, 1]} : vector<8x384xf32> to vector<1x128xf32>
    %9 = vector.extract_strided_slice %5 {offsets = [3, 0], sizes = [1, 128], strides = [1, 1]} : vector<8x384xf32> to vector<1x128xf32>
    %10 = vector.extract_strided_slice %5 {offsets = [4, 0], sizes = [1, 256], strides = [1, 1]} : vector<8x384xf32> to vector<1x256xf32>
    %11 = vector.extract_strided_slice %5 {offsets = [5, 0], sizes = [1, 128], strides = [1, 1]} : vector<8x384xf32> to vector<1x128xf32>
    %12 = vector.extract_strided_slice %5 {offsets = [6, 0], sizes = [1, 128], strides = [1, 1]} : vector<8x384xf32> to vector<1x128xf32>
    %13 = vector.extract_strided_slice %5 {offsets = [7, 0], sizes = [1, 128], strides = [1, 1]} : vector<8x384xf32> to vector<1x128xf32>
    %14 = arith.truncf %3 : vector<32x128xf32> to vector<32x128xbf16>
    %c0_5 = arith.constant 0 : index
    %c0_6 = arith.constant 0 : index
    %c0_7 = arith.constant 0 : index
    %15 = vector.load %arg5[%c0_5, %c0_6, %c0_7] : memref<1x128x384xbf16, #tpu.memory_space<vmem>>, vector<1x128x384xbf16>
    %16 = vector.shape_cast %15 : vector<1x128x384xbf16> to vector<128x384xbf16>
    %cst = arith.constant dense<0.000000e+00> : vector<32x384xf32>
    %17 = tpu.matmul %14, %16, %cst {dimension_numbers = #tpu.dot_dimension_numbers<[1], [0], [0], [1], [0, 0, 1, 1], [], []>} : vector<32x128xbf16>, vector<128x384xbf16>, vector<32x384xf32> -> vector<32x384xf32>
    %18 = vector.broadcast %6 : vector<1x384xf32> to vector<32x384xf32>
    %19 = arith.addf %17, %18 : vector<32x384xf32>
    %20 = vector.extract_strided_slice %19 {offsets = [0, 0], sizes = [32, 128], strides = [1, 1]} : vector<32x384xf32> to vector<32x128xf32>
    %21 = vector.extract_strided_slice %19 {offsets = [0, 128], sizes = [32, 128], strides = [1, 1]} : vector<32x384xf32> to vector<32x128xf32>
    %22 = vector.extract_strided_slice %19 {offsets = [0, 256], sizes = [32, 128], strides = [1, 1]} : vector<32x384xf32> to vector<32x128xf32>
    %23 = tpu.iota {dimensions = array<i32: 2>} : vector<1x1x16xi32>
    %c14_i32 = arith.constant 14 : i32
    %24 = vector.broadcast %c14_i32 : i32 to vector<1x1x16xi32>
    %25 = arith.cmpi slt, %23, %24 : vector<1x1x16xi32>
    %cst_8 = arith.constant 0.000000e+00 : f32
    %cst_9 = arith.constant -1.000000e+30 : f32
    %26 = vector.broadcast %cst_8 : f32 to vector<1x1x16xf32>
    %27 = vector.broadcast %cst_9 : f32 to vector<1x1x16xf32>
    %28 = arith.select %25, %26, %27 : vector<1x1x16xi1>, vector<1x1x16xf32>
    %29 = vector.extract_strided_slice %20 {offsets = [0, 0], sizes = [32, 32], strides = [1, 1]} : vector<32x128xf32> to vector<32x32xf32>
    %30 = vector.shape_cast %29 : vector<32x32xf32> to vector<2x16x32xf32>
    %31 = arith.truncf %30 : vector<2x16x32xf32> to vector<2x16x32xbf16>
    %32 = vector.extract_strided_slice %21 {offsets = [0, 0], sizes = [32, 32], strides = [1, 1]} : vector<32x128xf32> to vector<32x32xf32>
    %33 = vector.shape_cast %32 : vector<32x32xf32> to vector<2x16x32xf32>
    %34 = arith.truncf %33 : vector<2x16x32xf32> to vector<2x16x32xbf16>
    %35 = vector.extract_strided_slice %22 {offsets = [0, 0], sizes = [32, 32], strides = [1, 1]} : vector<32x128xf32> to vector<32x32xf32>
    %36 = vector.shape_cast %35 : vector<32x32xf32> to vector<2x16x32xf32>
    %37 = arith.truncf %36 : vector<2x16x32xf32> to vector<2x16x32xbf16>
    "tpu.trace_start"() <{level = 10 : i32, message = "bqd,bkd->bqk"}> : () -> ()
    %cst_10 = arith.constant dense<0.000000e+00> : vector<2x16x16xf32>
    %38 = tpu.matmul %31, %34, %cst_10 {dimension_numbers = #tpu.dot_dimension_numbers<[2], [2], [1], [1], [0, 0, 0, 1, 1, 1], [0], [0]>} : vector<2x16x32xbf16>, vector<2x16x32xbf16>, vector<2x16x16xf32> -> vector<2x16x16xf32>
    "tpu.trace_stop"() : () -> ()
    %cst_11 = arith.constant 0.176776692 : f32
    %39 = vector.broadcast %cst_11 : f32 to vector<2x16x16xf32>
    %40 = arith.mulf %38, %39 : vector<2x16x16xf32>
    %41 = vector.broadcast %28 : vector<1x1x16xf32> to vector<2x16x16xf32>
    %42 = arith.addf %40, %41 : vector<2x16x16xf32>
    %cst_12 = arith.constant dense<0xFF800000> : vector<2x16xf32>
    %43 = vector.multi_reduction <maximumf>, %42, %cst_12 [2] : vector<2x16x16xf32> to vector<2x16xf32>
    %44 = vector.shape_cast %43 : vector<2x16xf32> to vector<2x16x1xf32>
    %45 = vector.broadcast %44 : vector<2x16x1xf32> to vector<2x16x16xf32>
    %46 = arith.subf %42, %45 : vector<2x16x16xf32>
    %47 = math.exp %46 : vector<2x16x16xf32>
    %cst_13 = arith.constant dense<0.000000e+00> : vector<2x16xf32>
    %48 = vector.multi_reduction <add>, %47, %cst_13 [2] : vector<2x16x16xf32> to vector<2x16xf32>
    %49 = vector.shape_cast %48 : vector<2x16xf32> to vector<2x16x1xf32>
    %50 = tpu.reciprocal %49 {approx = true} : vector<2x16x1xf32> -> vector<2x16x1xf32>
    %51 = arith.mulf %49, %50 : vector<2x16x1xf32>
    %cst_14 = arith.constant 2.000000e+00 : f32
    %52 = vector.broadcast %cst_14 : f32 to vector<2x16x1xf32>
    %53 = arith.subf %52, %51 : vector<2x16x1xf32>
    %54 = arith.mulf %50, %53 : vector<2x16x1xf32>
    %55 = vector.broadcast %54 : vector<2x16x1xf32> to vector<2x16x16xf32>
    %56 = arith.mulf %47, %55 : vector<2x16x16xf32>
    %57 = arith.truncf %56 : vector<2x16x16xf32> to vector<2x16x16xbf16>
    "tpu.trace_start"() <{level = 10 : i32, message = "bqk,bkd->bqd"}> : () -> ()
    %cst_15 = arith.constant dense<0.000000e+00> : vector<2x16x32xf32>
    %58 = tpu.matmul %57, %37, %cst_15 {dimension_numbers = #tpu.dot_dimension_numbers<[2], [1], [1], [2], [0, 0, 0, 1, 1, 2], [0], [0]>} : vector<2x16x16xbf16>, vector<2x16x32xbf16>, vector<2x16x32xf32> -> vector<2x16x32xf32>
    "tpu.trace_stop"() : () -> ()
    %59 = vector.shape_cast %58 : vector<2x16x32xf32> to vector<32x32xf32>
    %60 = vector.extract_strided_slice %20 {offsets = [0, 32], sizes = [32, 32], strides = [1, 1]} : vector<32x128xf32> to vector<32x32xf32>
    %61 = vector.shape_cast %60 : vector<32x32xf32> to vector<2x16x32xf32>
    %62 = arith.truncf %61 : vector<2x16x32xf32> to vector<2x16x32xbf16>
    %63 = vector.extract_strided_slice %21 {offsets = [0, 32], sizes = [32, 32], strides = [1, 1]} : vector<32x128xf32> to vector<32x32xf32>
    %64 = vector.shape_cast %63 : vector<32x32xf32> to vector<2x16x32xf32>
    %65 = arith.truncf %64 : vector<2x16x32xf32> to vector<2x16x32xbf16>
    %66 = vector.extract_strided_slice %22 {offsets = [0, 32], sizes = [32, 32], strides = [1, 1]} : vector<32x128xf32> to vector<32x32xf32>
    %67 = vector.shape_cast %66 : vector<32x32xf32> to vector<2x16x32xf32>
    %68 = arith.truncf %67 : vector<2x16x32xf32> to vector<2x16x32xbf16>
    "tpu.trace_start"() <{level = 10 : i32, message = "bqd,bkd->bqk"}> : () -> ()
    %cst_16 = arith.constant dense<0.000000e+00> : vector<2x16x16xf32>
    %69 = tpu.matmul %62, %65, %cst_16 {dimension_numbers = #tpu.dot_dimension_numbers<[2], [2], [1], [1], [0, 0, 0, 1, 1, 1], [0], [0]>} : vector<2x16x32xbf16>, vector<2x16x32xbf16>, vector<2x16x16xf32> -> vector<2x16x16xf32>
    "tpu.trace_stop"() : () -> ()
    %cst_17 = arith.constant 0.176776692 : f32
    %70 = vector.broadcast %cst_17 : f32 to vector<2x16x16xf32>
    %71 = arith.mulf %69, %70 : vector<2x16x16xf32>
    %72 = vector.broadcast %28 : vector<1x1x16xf32> to vector<2x16x16xf32>
    %73 = arith.addf %71, %72 : vector<2x16x16xf32>
    %cst_18 = arith.constant dense<0xFF800000> : vector<2x16xf32>
    %74 = vector.multi_reduction <maximumf>, %73, %cst_18 [2] : vector<2x16x16xf32> to vector<2x16xf32>
    %75 = vector.shape_cast %74 : vector<2x16xf32> to vector<2x16x1xf32>
    %76 = vector.broadcast %75 : vector<2x16x1xf32> to vector<2x16x16xf32>
    %77 = arith.subf %73, %76 : vector<2x16x16xf32>
    %78 = math.exp %77 : vector<2x16x16xf32>
    %cst_19 = arith.constant dense<0.000000e+00> : vector<2x16xf32>
    %79 = vector.multi_reduction <add>, %78, %cst_19 [2] : vector<2x16x16xf32> to vector<2x16xf32>
    %80 = vector.shape_cast %79 : vector<2x16xf32> to vector<2x16x1xf32>
    %81 = tpu.reciprocal %80 {approx = true} : vector<2x16x1xf32> -> vector<2x16x1xf32>
    %82 = arith.mulf %80, %81 : vector<2x16x1xf32>
    %cst_20 = arith.constant 2.000000e+00 : f32
    %83 = vector.broadcast %cst_20 : f32 to vector<2x16x1xf32>
    %84 = arith.subf %83, %82 : vector<2x16x1xf32>
    %85 = arith.mulf %81, %84 : vector<2x16x1xf32>
    %86 = vector.broadcast %85 : vector<2x16x1xf32> to vector<2x16x16xf32>
    %87 = arith.mulf %78, %86 : vector<2x16x16xf32>
    %88 = arith.truncf %87 : vector<2x16x16xf32> to vector<2x16x16xbf16>
    "tpu.trace_start"() <{level = 10 : i32, message = "bqk,bkd->bqd"}> : () -> ()
    %cst_21 = arith.constant dense<0.000000e+00> : vector<2x16x32xf32>
    %89 = tpu.matmul %88, %68, %cst_21 {dimension_numbers = #tpu.dot_dimension_numbers<[2], [1], [1], [2], [0, 0, 0, 1, 1, 2], [0], [0]>} : vector<2x16x16xbf16>, vector<2x16x32xbf16>, vector<2x16x32xf32> -> vector<2x16x32xf32>
    "tpu.trace_stop"() : () -> ()
    %90 = vector.shape_cast %89 : vector<2x16x32xf32> to vector<32x32xf32>
    %91 = vector.extract_strided_slice %20 {offsets = [0, 64], sizes = [32, 32], strides = [1, 1]} : vector<32x128xf32> to vector<32x32xf32>
    %92 = vector.shape_cast %91 : vector<32x32xf32> to vector<2x16x32xf32>
    %93 = arith.truncf %92 : vector<2x16x32xf32> to vector<2x16x32xbf16>
    %94 = vector.extract_strided_slice %21 {offsets = [0, 64], sizes = [32, 32], strides = [1, 1]} : vector<32x128xf32> to vector<32x32xf32>
    %95 = vector.shape_cast %94 : vector<32x32xf32> to vector<2x16x32xf32>
    %96 = arith.truncf %95 : vector<2x16x32xf32> to vector<2x16x32xbf16>
    %97 = vector.extract_strided_slice %22 {offsets = [0, 64], sizes = [32, 32], strides = [1, 1]} : vector<32x128xf32> to vector<32x32xf32>
    %98 = vector.shape_cast %97 : vector<32x32xf32> to vector<2x16x32xf32>
    %99 = arith.truncf %98 : vector<2x16x32xf32> to vector<2x16x32xbf16>
    "tpu.trace_start"() <{level = 10 : i32, message = "bqd,bkd->bqk"}> : () -> ()
    %cst_22 = arith.constant dense<0.000000e+00> : vector<2x16x16xf32>
    %100 = tpu.matmul %93, %96, %cst_22 {dimension_numbers = #tpu.dot_dimension_numbers<[2], [2], [1], [1], [0, 0, 0, 1, 1, 1], [0], [0]>} : vector<2x16x32xbf16>, vector<2x16x32xbf16>, vector<2x16x16xf32> -> vector<2x16x16xf32>
    "tpu.trace_stop"() : () -> ()
    %cst_23 = arith.constant 0.176776692 : f32
    %101 = vector.broadcast %cst_23 : f32 to vector<2x16x16xf32>
    %102 = arith.mulf %100, %101 : vector<2x16x16xf32>
    %103 = vector.broadcast %28 : vector<1x1x16xf32> to vector<2x16x16xf32>
    %104 = arith.addf %102, %103 : vector<2x16x16xf32>
    %cst_24 = arith.constant dense<0xFF800000> : vector<2x16xf32>
    %105 = vector.multi_reduction <maximumf>, %104, %cst_24 [2] : vector<2x16x16xf32> to vector<2x16xf32>
    %106 = vector.shape_cast %105 : vector<2x16xf32> to vector<2x16x1xf32>
    %107 = vector.broadcast %106 : vector<2x16x1xf32> to vector<2x16x16xf32>
    %108 = arith.subf %104, %107 : vector<2x16x16xf32>
    %109 = math.exp %108 : vector<2x16x16xf32>
    %cst_25 = arith.constant dense<0.000000e+00> : vector<2x16xf32>
    %110 = vector.multi_reduction <add>, %109, %cst_25 [2] : vector<2x16x16xf32> to vector<2x16xf32>
    %111 = vector.shape_cast %110 : vector<2x16xf32> to vector<2x16x1xf32>
    %112 = tpu.reciprocal %111 {approx = true} : vector<2x16x1xf32> -> vector<2x16x1xf32>
    %113 = arith.mulf %111, %112 : vector<2x16x1xf32>
    %cst_26 = arith.constant 2.000000e+00 : f32
    %114 = vector.broadcast %cst_26 : f32 to vector<2x16x1xf32>
    %115 = arith.subf %114, %113 : vector<2x16x1xf32>
    %116 = arith.mulf %112, %115 : vector<2x16x1xf32>
    %117 = vector.broadcast %116 : vector<2x16x1xf32> to vector<2x16x16xf32>
    %118 = arith.mulf %109, %117 : vector<2x16x16xf32>
    %119 = arith.truncf %118 : vector<2x16x16xf32> to vector<2x16x16xbf16>
    "tpu.trace_start"() <{level = 10 : i32, message = "bqk,bkd->bqd"}> : () -> ()
    %cst_27 = arith.constant dense<0.000000e+00> : vector<2x16x32xf32>
    %120 = tpu.matmul %119, %99, %cst_27 {dimension_numbers = #tpu.dot_dimension_numbers<[2], [1], [1], [2], [0, 0, 0, 1, 1, 2], [0], [0]>} : vector<2x16x16xbf16>, vector<2x16x32xbf16>, vector<2x16x32xf32> -> vector<2x16x32xf32>
    "tpu.trace_stop"() : () -> ()
    %121 = vector.shape_cast %120 : vector<2x16x32xf32> to vector<32x32xf32>
    %122 = vector.extract_strided_slice %20 {offsets = [0, 96], sizes = [32, 32], strides = [1, 1]} : vector<32x128xf32> to vector<32x32xf32>
    %123 = vector.shape_cast %122 : vector<32x32xf32> to vector<2x16x32xf32>
    %124 = arith.truncf %123 : vector<2x16x32xf32> to vector<2x16x32xbf16>
    %125 = vector.extract_strided_slice %21 {offsets = [0, 96], sizes = [32, 32], strides = [1, 1]} : vector<32x128xf32> to vector<32x32xf32>
    %126 = vector.shape_cast %125 : vector<32x32xf32> to vector<2x16x32xf32>
    %127 = arith.truncf %126 : vector<2x16x32xf32> to vector<2x16x32xbf16>
    %128 = vector.extract_strided_slice %22 {offsets = [0, 96], sizes = [32, 32], strides = [1, 1]} : vector<32x128xf32> to vector<32x32xf32>
    %129 = vector.shape_cast %128 : vector<32x32xf32> to vector<2x16x32xf32>
    %130 = arith.truncf %129 : vector<2x16x32xf32> to vector<2x16x32xbf16>
    "tpu.trace_start"() <{level = 10 : i32, message = "bqd,bkd->bqk"}> : () -> ()
    %cst_28 = arith.constant dense<0.000000e+00> : vector<2x16x16xf32>
    %131 = tpu.matmul %124, %127, %cst_28 {dimension_numbers = #tpu.dot_dimension_numbers<[2], [2], [1], [1], [0, 0, 0, 1, 1, 1], [0], [0]>} : vector<2x16x32xbf16>, vector<2x16x32xbf16>, vector<2x16x16xf32> -> vector<2x16x16xf32>
    "tpu.trace_stop"() : () -> ()
    %cst_29 = arith.constant 0.176776692 : f32
    %132 = vector.broadcast %cst_29 : f32 to vector<2x16x16xf32>
    %133 = arith.mulf %131, %132 : vector<2x16x16xf32>
    %134 = vector.broadcast %28 : vector<1x1x16xf32> to vector<2x16x16xf32>
    %135 = arith.addf %133, %134 : vector<2x16x16xf32>
    %cst_30 = arith.constant dense<0xFF800000> : vector<2x16xf32>
    %136 = vector.multi_reduction <maximumf>, %135, %cst_30 [2] : vector<2x16x16xf32> to vector<2x16xf32>
    %137 = vector.shape_cast %136 : vector<2x16xf32> to vector<2x16x1xf32>
    %138 = vector.broadcast %137 : vector<2x16x1xf32> to vector<2x16x16xf32>
    %139 = arith.subf %135, %138 : vector<2x16x16xf32>
    %140 = math.exp %139 : vector<2x16x16xf32>
    %cst_31 = arith.constant dense<0.000000e+00> : vector<2x16xf32>
    %141 = vector.multi_reduction <add>, %140, %cst_31 [2] : vector<2x16x16xf32> to vector<2x16xf32>
    %142 = vector.shape_cast %141 : vector<2x16xf32> to vector<2x16x1xf32>
    %143 = tpu.reciprocal %142 {approx = true} : vector<2x16x1xf32> -> vector<2x16x1xf32>
    %144 = arith.mulf %142, %143 : vector<2x16x1xf32>
    %cst_32 = arith.constant 2.000000e+00 : f32
    %145 = vector.broadcast %cst_32 : f32 to vector<2x16x1xf32>
    %146 = arith.subf %145, %144 : vector<2x16x1xf32>
    %147 = arith.mulf %143, %146 : vector<2x16x1xf32>
    %148 = vector.broadcast %147 : vector<2x16x1xf32> to vector<2x16x16xf32>
    %149 = arith.mulf %140, %148 : vector<2x16x16xf32>
    %150 = arith.truncf %149 : vector<2x16x16xf32> to vector<2x16x16xbf16>
    "tpu.trace_start"() <{level = 10 : i32, message = "bqk,bkd->bqd"}> : () -> ()
    %cst_33 = arith.constant dense<0.000000e+00> : vector<2x16x32xf32>
    %151 = tpu.matmul %150, %130, %cst_33 {dimension_numbers = #tpu.dot_dimension_numbers<[2], [1], [1], [2], [0, 0, 0, 1, 1, 2], [0], [0]>} : vector<2x16x16xbf16>, vector<2x16x32xbf16>, vector<2x16x32xf32> -> vector<2x16x32xf32>
    "tpu.trace_stop"() : () -> ()
    %152 = vector.shape_cast %151 : vector<2x16x32xf32> to vector<32x32xf32>
    %153 = tpu.concatenate %59, %90, %121, %152 in 1 : vector<32x32xf32>, vector<32x32xf32>, vector<32x32xf32>, vector<32x32xf32> -> vector<32x128xf32>
    %154 = arith.truncf %153 : vector<32x128xf32> to vector<32x128xbf16>
    %c0_34 = arith.constant 0 : index
    %c0_35 = arith.constant 0 : index
    %c0_36 = arith.constant 0 : index
    %155 = vector.load %arg6[%c0_34, %c0_35, %c0_36] : memref<1x128x128xbf16, #tpu.memory_space<vmem>>, vector<1x128x128xbf16>
    %156 = vector.shape_cast %155 : vector<1x128x128xbf16> to vector<128x128xbf16>
    %cst_37 = arith.constant dense<0.000000e+00> : vector<32x128xf32>
    %157 = tpu.matmul %154, %156, %cst_37 {dimension_numbers = #tpu.dot_dimension_numbers<[1], [0], [0], [1], [0, 0, 1, 1], [], []>} : vector<32x128xbf16>, vector<128x128xbf16>, vector<32x128xf32> -> vector<32x128xf32>
    %158 = vector.broadcast %7 : vector<1x128xf32> to vector<32x128xf32>
    %159 = arith.addf %157, %158 : vector<32x128xf32>
    %160 = arith.addf %3, %159 : vector<32x128xf32>
    %cst_38 = arith.constant dense<0.000000e+00> : vector<32xf32>
    %161 = vector.multi_reduction <add>, %160, %cst_38 [1] : vector<32x128xf32> to vector<32xf32>
    %162 = vector.shape_cast %161 : vector<32xf32> to vector<32x1xf32>
    %cst_39 = arith.constant 1.280000e+02 : f32
    %163 = vector.broadcast %cst_39 : f32 to vector<32x1xf32>
    %164 = arith.divf %162, %163 : vector<32x1xf32>
    %165 = vector.broadcast %164 : vector<32x1xf32> to vector<32x128xf32>
    %166 = arith.subf %160, %165 : vector<32x128xf32>
    %167 = arith.mulf %166, %166 : vector<32x128xf32>
    %cst_40 = arith.constant dense<0.000000e+00> : vector<32xf32>
    %168 = vector.multi_reduction <add>, %167, %cst_40 [1] : vector<32x128xf32> to vector<32xf32>
    %169 = vector.shape_cast %168 : vector<32xf32> to vector<32x1xf32>
    %cst_41 = arith.constant 1.280000e+02 : f32
    %170 = vector.broadcast %cst_41 : f32 to vector<32x1xf32>
    %171 = arith.divf %169, %170 : vector<32x1xf32>
    %cst_42 = arith.constant 9.99999974E-6 : f32
    %172 = vector.broadcast %cst_42 : f32 to vector<32x1xf32>
    %173 = arith.addf %171, %172 : vector<32x1xf32>
    %174 = math.rsqrt %173 : vector<32x1xf32>
    %175 = vector.broadcast %174 : vector<32x1xf32> to vector<32x128xf32>
    %176 = arith.mulf %166, %175 : vector<32x128xf32>
    %177 = vector.broadcast %8 : vector<1x128xf32> to vector<32x128xf32>
    %178 = arith.mulf %176, %177 : vector<32x128xf32>
    %179 = vector.broadcast %9 : vector<1x128xf32> to vector<32x128xf32>
    %180 = arith.addf %178, %179 : vector<32x128xf32>
    %181 = arith.truncf %180 : vector<32x128xf32> to vector<32x128xbf16>
    %c0_43 = arith.constant 0 : index
    %c0_44 = arith.constant 0 : index
    %c0_45 = arith.constant 0 : index
    %182 = vector.load %arg7[%c0_43, %c0_44, %c0_45] : memref<1x128x256xbf16, #tpu.memory_space<vmem>>, vector<1x128x256xbf16>
    %183 = vector.shape_cast %182 : vector<1x128x256xbf16> to vector<128x256xbf16>
    %cst_46 = arith.constant dense<0.000000e+00> : vector<32x256xf32>
    %184 = tpu.matmul %181, %183, %cst_46 {dimension_numbers = #tpu.dot_dimension_numbers<[1], [0], [0], [1], [0, 0, 1, 1], [], []>} : vector<32x128xbf16>, vector<128x256xbf16>, vector<32x256xf32> -> vector<32x256xf32>
    %185 = vector.broadcast %10 : vector<1x256xf32> to vector<32x256xf32>
    %186 = arith.addf %184, %185 : vector<32x256xf32>
    %cst_47 = arith.constant 5.000000e-01 : f32
    %187 = vector.broadcast %cst_47 : f32 to vector<32x256xf32>
    %188 = arith.mulf %187, %186 : vector<32x256xf32>
    %cst_48 = arith.constant 0.707106769 : f32
    %189 = vector.broadcast %cst_48 : f32 to vector<32x256xf32>
    %190 = arith.mulf %186, %189 : vector<32x256xf32>
    %191 = math.erf %190 : vector<32x256xf32>
    %cst_49 = arith.constant 1.000000e+00 : f32
    %192 = vector.broadcast %cst_49 : f32 to vector<32x256xf32>
    %193 = arith.addf %192, %191 : vector<32x256xf32>
    %194 = arith.mulf %188, %193 : vector<32x256xf32>
    %195 = arith.truncf %194 : vector<32x256xf32> to vector<32x256xbf16>
    %c0_50 = arith.constant 0 : index
    %c0_51 = arith.constant 0 : index
    %c0_52 = arith.constant 0 : index
    %196 = vector.load %arg8[%c0_50, %c0_51, %c0_52] : memref<1x256x128xbf16, #tpu.memory_space<vmem>>, vector<1x256x128xbf16>
    %197 = vector.shape_cast %196 : vector<1x256x128xbf16> to vector<256x128xbf16>
    %cst_53 = arith.constant dense<0.000000e+00> : vector<32x128xf32>
    %198 = tpu.matmul %195, %197, %cst_53 {dimension_numbers = #tpu.dot_dimension_numbers<[1], [0], [0], [1], [0, 0, 1, 1], [], []>} : vector<32x256xbf16>, vector<256x128xbf16>, vector<32x128xf32> -> vector<32x128xf32>
    %199 = vector.broadcast %11 : vector<1x128xf32> to vector<32x128xf32>
    %200 = arith.addf %198, %199 : vector<32x128xf32>
    %201 = arith.addf %180, %200 : vector<32x128xf32>
    %cst_54 = arith.constant dense<0.000000e+00> : vector<32xf32>
    %202 = vector.multi_reduction <add>, %201, %cst_54 [1] : vector<32x128xf32> to vector<32xf32>
    %203 = vector.shape_cast %202 : vector<32xf32> to vector<32x1xf32>
    %cst_55 = arith.constant 1.280000e+02 : f32
    %204 = vector.broadcast %cst_55 : f32 to vector<32x1xf32>
    %205 = arith.divf %203, %204 : vector<32x1xf32>
    %206 = vector.broadcast %205 : vector<32x1xf32> to vector<32x128xf32>
    %207 = arith.subf %201, %206 : vector<32x128xf32>
    %208 = arith.mulf %207, %207 : vector<32x128xf32>
    %cst_56 = arith.constant dense<0.000000e+00> : vector<32xf32>
    %209 = vector.multi_reduction <add>, %208, %cst_56 [1] : vector<32x128xf32> to vector<32xf32>
    %210 = vector.shape_cast %209 : vector<32xf32> to vector<32x1xf32>
    %cst_57 = arith.constant 1.280000e+02 : f32
    %211 = vector.broadcast %cst_57 : f32 to vector<32x1xf32>
    %212 = arith.divf %210, %211 : vector<32x1xf32>
    %cst_58 = arith.constant 9.99999974E-6 : f32
    %213 = vector.broadcast %cst_58 : f32 to vector<32x1xf32>
    %214 = arith.addf %212, %213 : vector<32x1xf32>
    %215 = math.rsqrt %214 : vector<32x1xf32>
    %216 = vector.broadcast %215 : vector<32x1xf32> to vector<32x128xf32>
    %217 = arith.mulf %207, %216 : vector<32x128xf32>
    %218 = vector.broadcast %12 : vector<1x128xf32> to vector<32x128xf32>
    %219 = arith.mulf %217, %218 : vector<32x128xf32>
    %220 = vector.broadcast %13 : vector<1x128xf32> to vector<32x128xf32>
    %221 = arith.addf %219, %220 : vector<32x128xf32>
    %c0_59 = arith.constant 0 : index
    %c0_60 = arith.constant 0 : index
    %222 = vector.load %arg11[%c0_59, %c0_60] : memref<32x128xf32, #tpu.memory_space<vmem>>, vector<32x128xf32>
    tpu.vector_store %arg11[%c0_59, %c0_60], %221 {strides = array<i32>} : memref<32x128xf32, #tpu.memory_space<vmem>>, vector<32x128xf32>,
    %c1_i32 = arith.constant 1 : i32
    %223 = arith.cmpi eq, %arg1, %c1_i32 : i32
    %224 = arith.extui %223 : i1 to i32
    %c0_i32_61 = arith.constant 0 : i32
    %225 = arith.cmpi ne, %224, %c0_i32_61 : i32
    scf.if %225 {
      %226 = vector.shape_cast %221 : vector<32x128xf32> to vector<2x16x128xf32>
      %c0_62 = arith.constant 0 : index
      %c0_63 = arith.constant 0 : index
      %c0_64 = arith.constant 0 : index
      %227 = vector.load %arg10[%c0_62, %c0_63, %c0_64] : memref<2x16x128xf32, #tpu.memory_space<vmem>>, vector<2x16x128xf32>
      tpu.vector_store %arg10[%c0_62, %c0_63, %c0_64], %226 {strides = array<i32>} : memref<2x16x128xf32, #tpu.memory_space<vmem>>, vector<2x16x128xf32>,
    } else {
    }
    return
  }
  func.func @transform_0(%arg0: i32, %arg1: i32) -> (i32, i32, i32) {
    %c0_i32 = arith.constant 0 : i32
    %c0_i32_0 = arith.constant 0 : i32
    %c0_i32_1 = arith.constant 0 : i32
    return %arg0, %c0_i32, %c0_i32_0 : i32, i32, i32
  }
  func.func @transform_1(%arg0: i32, %arg1: i32) -> (i32, i32) {
    %c0_i32 = arith.constant 0 : i32
    %c0_i32_0 = arith.constant 0 : i32
    %c0_i32_1 = arith.constant 0 : i32
    return %c0_i32, %c0_i32_0 : i32, i32
  }
  func.func @transform_2(%arg0: i32, %arg1: i32) -> (i32, i32) {
    %c0_i32 = arith.constant 0 : i32
    %c0_i32_0 = arith.constant 0 : i32
    %c0_i32_1 = arith.constant 0 : i32
    return %c0_i32, %c0_i32_0 : i32, i32
  }
  func.func @transform_3(%arg0: i32, %arg1: i32) -> (i32, i32, i32) {
    %c0_i32 = arith.constant 0 : i32
    %c0_i32_0 = arith.constant 0 : i32
    %c0_i32_1 = arith.constant 0 : i32
    return %arg1, %c0_i32, %c0_i32_0 : i32, i32, i32
  }
  func.func @transform_4(%arg0: i32, %arg1: i32) -> (i32, i32, i32) {
    %c0_i32 = arith.constant 0 : i32
    %c0_i32_0 = arith.constant 0 : i32
    %c0_i32_1 = arith.constant 0 : i32
    return %arg1, %c0_i32, %c0_i32_0 : i32, i32, i32
  }
  func.func @transform_5(%arg0: i32, %arg1: i32) -> (i32, i32, i32) {
    %c0_i32 = arith.constant 0 : i32
    %c0_i32_0 = arith.constant 0 : i32
    %c0_i32_1 = arith.constant 0 : i32
    return %arg1, %c0_i32, %c0_i32_0 : i32, i32, i32
  }
  func.func @transform_6(%arg0: i32, %arg1: i32) -> (i32, i32, i32) {
    %c0_i32 = arith.constant 0 : i32
    %c0_i32_0 = arith.constant 0 : i32
    %c0_i32_1 = arith.constant 0 : i32
    return %arg1, %c0_i32, %c0_i32_0 : i32, i32, i32
  }
  func.func @transform_7(%arg0: i32, %arg1: i32) -> (i32, i32, i32) {
    %c0_i32 = arith.constant 0 : i32
    %c0_i32_0 = arith.constant 0 : i32
    %c0_i32_1 = arith.constant 0 : i32
    return %arg1, %c0_i32, %c0_i32_0 : i32, i32, i32
  }
  func.func @transform_8(%arg0: i32, %arg1: i32) -> (i32, i32, i32) {
    %c0_i32 = arith.constant 0 : i32
    %c0_i32_0 = arith.constant 0 : i32
    %c0_i32_1 = arith.constant 0 : i32
    return %arg0, %c0_i32, %c0_i32_0 : i32, i32, i32
  }
}

</mosaic_0001>

<bundles_post_ra>
// kernel: tpu_custom_call.1
= control target key start
LH: loop header
LB: loop body
LE: loop exit
PB: predicated region body
PF: predicated region fallthrough
CT: control target
= control target key end

     0   :  { %s5015_s0 = inlined_call_operand.hbm [shape: f32[4,16,20], index: 0, kind: input, shape index: {}]   ;;  %s5016_s1 = inlined_call_operand.hbm [shape: bf16[20,128], index: 1, kind: input, shape index: {}]   ;;  %s5017_s2 = inlined_call_operand.hbm [shape: f32[16,128], index: 2, kind: input, shape index: {}]   ;;  %s5018_s3 = inlined_call_operand.hbm [shape: bf16[2,128,384], index: 3, kind: input, shape index: {}]   ;;  %s5019_s4 = inlined_call_operand.hbm [shape: bf16[2,128,128], index: 4, kind: input, shape index: {}]   ;;  %s5020_s5 = inlined_call_operand.hbm [shape: bf16[2,128,256], index: 5, kind: input, shape index: {}]   ;;  %s5021_s6 = inlined_call_operand.hbm [shape: bf16[2,256,128], index: 6, kind: input, shape index: {}]   ;;  %s5022_s7 = inlined_call_operand.hbm [shape: f32[2,8,384], index: 7, kind: input, shape index: {}]   ;;  %s5023_s8 = inlined_call_operand.hbm [shape: f32[4,16,128], index: 8, kind: output, shape index: {}]  }
   0x1   :  { %5061 = sst [smem:[#allocation35_spill]] %s5016_s1 }
   0x2   :  { %5062 = sst [smem:[#allocation36_spill]] %s5017_s2 }
   0x3   :  { %5063 = sst [smem:[#allocation37_spill]] %s5018_s3 }
   0x4   :  { %5064 = sst [smem:[#allocation38_spill]] %s5020_s5 }
   0x5   :  { %5065 = sst [smem:[#allocation39_spill]] %s5021_s6 }
   0x6   :  { %5066 = sst [smem:[#allocation40_spill]] %s5022_s7 }
   0x7   :  { %5067 = sst [smem:[#allocation41_spill]] %s5023_s8 }
   0x8   :  { %13 = vsyncpa [#allocation4], 0 }
   0x9   :  { %15 = vsyncpa [#allocation4 + $0x1], 0 }
   0xa   :  { %16 = vsyncpa [#allocation7], 0 }
   0xb   :  { %17 = vsyncpa [#allocation10], 0 }
   0xc   :  { %19 = vsyncpa [#allocation10 + $0x1], 0 }
   0xd   :  { %20 = vsyncpa [#allocation13], 0 }
   0xe   :  { %22 = vsyncpa [#allocation13 + $0x1], 0 }
   0xf   :  { %23 = vsyncpa [#allocation16], 0 }
  0x10   :  { %25 = vsyncpa [#allocation16 + $0x1], 0 }
  0x11   :  { %26 = vsyncpa [#allocation5], 0 }
  0x12   :  { %28 = vsyncpa [#allocation5 + $0x1], 0  ;;  %s4106_s27 = smov 0   ;;  %s4108_s28 = smov 0  }
  0x13   :  { %s4110_s29 = smov 0   ;;  %s4112_s30 = smov 0  }
  0x14   :  { %s4114_s9 = smov 0   ;;  %s4116_s10 = smov 0  }
  0x15   :  { %s4118_s11 = smov 0   ;;  %s4120_s12 = smov 0  }
  0x16   :  { %s4122_s13 = smov 0   ;;  %s4124_s14 = smov 0  }
  0x17   :  { %s4126_s15 = smov 0  }
  0x18 LB: > { %5068 = sst [smem:[#allocation24_spill]] %s3999_s28  ;;  %s4160_s16 = sadd.s32 4294967295, %s4035_s15   ;;  %s4035_s15 = sphi %s4126_s15, %s34_s15   ;;  %s4031_s14 = sphi %s4124_s14, %s5142_s14   ;;  %s4027_s13 = sphi %s4122_s13, %s5141_s13   ;;  %s4023_s12 = sphi %s4120_s12, %s5140_s12   ;;  %s4019_s11 = sphi %s4118_s11, %s5139_s11   ;;  %s4015_s10 = sphi %s4116_s10, %s5138_s10   ;;  %s4011_s9 = sphi %s4114_s9, %s5137_s9   ;;  %s4007_s30 = sphi %s4112_s30, %s5136_s30   ;;  %s4003_s29 = sphi %s4110_s29, %s5135_s29   ;;  %s3999_s28 = sphi %s4108_s28, %s5134_s28   ;;  %s3995_s27 = sphi %s4106_s27, %s5131_s27  }
  0x19   : > { %5069 = sst [smem:[#allocation25_spill]] %s4007_s30  ;;  %s2922_s17 = sadd.s32 4294967294, %s4035_s15  }
  0x1a   : > { %5070 = sst [smem:[#allocation26_spill]] %s4019_s11  ;;  %p66_p0 = scmp.ne.s32.totalorder %s4011_s9, %s4007_s30 }
  0x1b   : > { %5071 = sst [smem:[#allocation27_spill]] %s4023_s12  ;;  %p5027_p1 = scmp.eq.s32.totalorder %s4160_s16, 0 }
  0x1c   : > { %p134_p2 = scmp.ne.s32.totalorder %s3999_s28, %s3995_s27  ;;  %p268_p5 = scmp.eq.s32.totalorder %s2922_s17, 3 }
  0x1d   : > { %p4170_p4 = por %p5027_p1, %p66_p0  ;;  %p2923_p7 = scmp.ge.s32.totalorder %s4035_s15, 1 }
  0x1e   : > { %p4176_p6 = por %p134_p2, %p5027_p1  ;;  %p4181_p8 = por %p268_p5, %p66_p0 }
  0x1f   : > { %s5072_s18 = scalar_select %p4170_p4, 1, 0 }
  0x20   : > { %s5074_s19 = scalar_select %p4176_p6, 1, 0 }
  0x21   : > { %5073 = sst [smem:[#allocation28_spill]] %s5072_s18  ;;  %p275_p9 = scmp.lt.s32.totalorder %s4035_s15, 5 }
  0x22   : > { %5075 = sst [smem:[#allocation29_spill]] %s5074_s19  ;;  %s4037_s22 = smov [#allocation6]  }
  0x23   : > { %s5076_s20 = scalar_select %p4181_p8, 1, 0 }
  0x24   : > { %p4186_p10 = pnand %p2923_p7, %p275_p9  ;;  %s287_s23 = sshll.u32 %s4037_s22, 4  ;;  %s288_s23 = int_to_ptr.vmem [resolvable:$true] %s287_s23 }
  0x25   : > { %5077 = sst [smem:[#allocation30_spill]] %s5076_s20  ;;  %s5081_s1 = sld [smem:[#allocation35_spill]] }
  0x26   : > { %s5078_s21 = scalar_select %p4186_p10, 1, 0 }
  0x27   : > { %p3306_p11 = pneg %p4186_p10 }
  0x28   : > { %5079 = sst [smem:[#allocation31_spill]] %s5078_s21 }
  0x29   : > { %p4194_p12 = pnand %p3306_p11, %p5027_p1 }
  0x2b   : > { %s5080_s24 = scalar_select %p4194_p12, 1, 0 }
  0x2c   : > { %s3661_s27 = scalar_lea.hbm %s5081_s1, 192  ;;  %p5041_p2 = pneg %p4194_p12 }
  0x2d   : > { %p3662_p0 = scmp.ne.s32.totalorder %s5081_s1, %s3661_s27  ;;  %p3668_p9 = scmp.lt.u32.totalorder %s3661_s27, %s5081_s1 }
  0x2f   : > { %p3664_p5 = pnand %p5041_p2, %p3662_p0 }
  0x31   : > { %p3665_p7 = pneg %p3664_p5 }
  0x33   : > { %p3670_p11 = pnand %p3668_p9, %p3665_p7 }
  0x35   : > { %3673 = shalt.err (!%p3670_p11)
}
  0x36   : > { %s3674_s8 = scalar_lea.vmem %s288_s23, 192  ;;  %p3682_p8 = scmp.lt.s32.totalorder %s288_s23, %s288_s23 }
  0x37   : > { %p3675_p1 = scmp.ne.s32.totalorder %s288_s23, %s3674_s8  ;;  %p3683_p6 = scmp.lt.s32.totalorder %s3674_s8, %s3674_s8 }
  0x39   : > { %p3677_p3 = pnand %p3675_p1, %p5041_p2  ;;  %p3684_p4 = por %p3683_p6, %p3682_p8 }
  0x3b   : > { %p3678_p13 = pneg %p3677_p3 }
  0x3d   : > { %p3685_p10 = pnand %p3684_p4, %p3678_p13 }
  0x3f   : > { %3688 = shalt.err (!%p3685_p10)
}
  0x40   : > { %s5035_s20 = smov 64   ;;  %s5037_s30 = smov 4  }
  0x41   : > { %3309 = dma.hbm_to_vmem [thread:$0]  (!%p4194_p12), %s5081_s1, 192, %s288_s23, [#allocation7], %s5035_s20, %s5035_s20, %s5037_s30  }
  0x42   : > { %p128_p1 = scmp.ne.s32.totalorder %s4003_s29, %s3999_s28  ;;  %p5040_p3 = scmp.lt.s32.totalorder %s4035_s15, 4 }
  0x43   : > { %s5039_s27 = sand.u32 1, %s4035_s15   ;;  %p5082_p4 = scmp.eq.s32.totalorder %s4035_s15, 0 }
  0x44   : > { %s4232_s17 = sand.u32 1, %s4003_s29   ;;  %s3279_s22 = smul.u32 3072, %s4027_s13 }
  0x45   : > { %p130_p6 = por %p128_p1, %p5082_p4  ;;  %s3278_s12 = smul.u32 192, %s4232_s17 }
  0x46   : > { %s5084_s3 = sld [smem:[#allocation37_spill]]  ;;  %s4251_s20 = scalar_lea.sflag [#allocation10], %s5039_s27 }
  0x47   : > { %p4238_p8 = pnand %p5040_p3, %p130_p6  ;;  %s340_s8 = scalar_lea.vmem [#allocation9], %s3278_s12 }
  0x48   : > { %s347_s25 = sshll.u32 %s340_s8, 4  ;;  %s4247_s25 = int_to_ptr.vmem [resolvable:$true] %s347_s25 }
  0x49   : > { %s5083_s11 = scalar_select %p4238_p8, 1, 0 }
  0x4a   : > { %p4257_p13 = pneg %p4238_p8 }
  0x4c   : > { %s4245_s23 = scalar_lea.hbm %s5084_s3, %s3279_s22  ;;  %s3694_s12 = scalar_lea.hbm %s5084_s3, 6144 }
  0x4d   : > { %s3689_s30 = scalar_lea.hbm %s4245_s23, 3072  ;;  %p3695_p7 = scmp.lt.u32.totalorder %s4245_s23, %s5084_s3 }
  0x4e   : > { %p3690_p10 = scmp.ne.s32.totalorder %s4245_s23, %s3689_s30  ;;  %p3696_p9 = scmp.lt.u32.totalorder %s3694_s12, %s3689_s30 }
  0x4f   : > { %s5085_s26 = scalar_select %p4257_p13, 1, 0 }
  0x50   : > { %p3692_p0 = pnand %p4257_p13, %p3690_p10  ;;  %p3697_p11 = por %p3696_p9, %p3695_p7 }
  0x51   : > { %p3698_p1 = scmp.lt.u32.totalorder %s3689_s30, %s4245_s23 }
  0x52   : > { %p3693_p5 = pneg %p3692_p0 }
  0x53   : > { %p3699_p4 = por %p3698_p1, %p3697_p11 }
  0x55   : > { %p3700_p6 = pnand %p3699_p4, %p3693_p5 }
  0x57   : > { %3703 = shalt.err (!%p3700_p6)
}
  0x58   : > { %s3704_s27 = scalar_lea.vmem %s4247_s25, 3072  ;;  %s4040_s18 = smov [#allocation9]  }
  0x59   : > { %p3705_p10 = scmp.ne.s32.totalorder %s4247_s25, %s3704_s27  ;;  %s3709_s19 = sshll.u32 %s4040_s18, 4  ;;  %s3710_s19 = int_to_ptr.vmem [resolvable:$false] %s3709_s19 }
  0x5a   : > { %s3711_s22 = scalar_lea.vmem %s3710_s19, 6144  ;;  %p3712_p2 = scmp.lt.s32.totalorder %s4247_s25, %s3710_s19 }
  0x5b   : > { %p3707_p0 = pnand %p3705_p10, %p4257_p13  ;;  %p3713_p12 = scmp.lt.s32.totalorder %s3711_s22, %s3704_s27 }
  0x5d   : > { %p3708_p3 = pneg %p3707_p0  ;;  %p3714_p7 = por %p3713_p12, %p3712_p2 }
  0x5f   : > { %p3715_p9 = pnand %p3714_p7, %p3708_p3 }
  0x61   : > { %3718 = shalt.err (!%p3715_p9)
}
  0x62   : > { %s4041_s30 = smov 192   ;;  %s4042_s12 = smov 12  }
  0x63   : > { %3319 = dma.hbm_to_vmem [thread:$0]  (!%p4238_p8), %s4245_s23, 3072, %s4247_s25, %s4251_s20, %s4041_s30, %s4041_s30, %s4042_s12  }
  0x64   : > { %s5046_s8 = sshll.u32 %s4232_s17, 7  ;;  %s3045_s18 = sshll.u32 %s4027_s13, 11 }
  0x65   : > { %s5086_s5 = sld [smem:[#allocation38_spill]]  ;;  %s382_s1 = scalar_lea.vmem [#allocation12], %s5046_s8 }
  0x66   : > { %s389_s3 = sshll.u32 %s382_s1, 4  ;;  %s5087_s6 = sld [smem:[#allocation39_spill]]  ;;  %s4290_s3 = int_to_ptr.vmem [resolvable:$true] %s389_s3 }
  0x67   : > { %s5088_s25 = sand.u32 1, %s4035_s15  }
  0x68   : > { %s4299_s30 = scalar_lea.sflag [#allocation13], %s5088_s25 }
  0x6b   : > { %s4286_s22 = scalar_lea.hbm %s5086_s5, %s3045_s18  ;;  %s3724_s8 = scalar_lea.hbm %s5086_s5, 4096 }
  0x6c   : > { %s4295_s23 = scalar_lea.hbm %s5087_s6, %s3045_s18  ;;  %s3719_s12 = scalar_lea.hbm %s4286_s22, 2048 }
  0x6d   : > { %p3720_p12 = scmp.ne.s32.totalorder %s4286_s22, %s3719_s12  ;;  %p3725_p5 = scmp.lt.u32.totalorder %s4286_s22, %s5086_s5 }
  0x6e   : > { %p3726_p11 = scmp.lt.u32.totalorder %s3724_s8, %s3719_s12  ;;  %p3728_p4 = scmp.lt.u32.totalorder %s3719_s12, %s4286_s22 }
  0x6f   : > { %p3722_p2 = pnand %p3720_p12, %p4257_p13 }
  0x70   : > { %p3727_p1 = por %p3726_p11, %p3725_p5 }
  0x71   : > { %p3723_p3 = pneg %p3722_p2 }
  0x72   : > { %p3729_p6 = por %p3728_p4, %p3727_p1 }
  0x74   : > { %p3730_p10 = pnand %p3729_p6, %p3723_p3 }
  0x76   : > { %3733 = shalt.err (!%p3730_p10)
}
  0x77   : > { %s3734_s28 = scalar_lea.vmem %s4290_s3, 2048  ;;  %s4043_s21 = smov [#allocation12]  }
  0x78   : > { %p3735_p0 = scmp.ne.s32.totalorder %s4290_s3, %s3734_s28  ;;  %s3739_s18 = sshll.u32 %s4043_s21, 4  ;;  %s3740_s18 = int_to_ptr.vmem [resolvable:$false] %s3739_s18 }
  0x79   : > { %s3741_s7 = scalar_lea.vmem %s3740_s18, 4096  ;;  %p3742_p12 = scmp.lt.s32.totalorder %s4290_s3, %s3740_s18 }
  0x7a   : > { %p3737_p7 = pnand %p3735_p0, %p4257_p13  ;;  %p3743_p2 = scmp.lt.s32.totalorder %s3741_s7, %s3734_s28 }
  0x7c   : > { %p3738_p9 = pneg %p3737_p7  ;;  %p3744_p5 = por %p3743_p2, %p3742_p12 }
  0x7e   : > { %p3745_p11 = pnand %p3744_p5, %p3738_p9 }
  0x80   : > { %3748 = shalt.err (!%p3745_p11)
}
  0x81   : > { %s5053_s8 = smov 128   ;;  %s5054_s25 = smov 8  }
  0x82   : > { %3325 = dma.hbm_to_vmem [thread:$0]  (!%p4238_p8), %s4286_s22, 2048, %s4290_s3, %s4299_s30, %s5053_s8, %s5053_s8, %s5054_s25  }
  0x83   : > { %s5089_s12 = sshll.u32 %s4232_s17, 7  ;;  %s4046_s1 = smov [#allocation8]  }
  0x84   : > { %s403_s19 = scalar_lea.vmem [#allocation14], %s5089_s12  ;;  %s300_s28 = sshll.u32 %s4046_s1, 4  ;;  %s301_s28 = int_to_ptr.vmem [resolvable:$true] %s300_s28 }
  0x85   : > { %s410_s27 = sshll.u32 %s403_s19, 4  ;;  %s5090_s2 = sld [smem:[#allocation36_spill]]  ;;  %s4328_s27 = int_to_ptr.vmem [resolvable:$true] %s410_s27 }
  0x86   : > { %p5091_p1 = scmp.ne.s32.totalorder %s5080_s24, 0 }
  0x88   : > { %p5092_p4 = pneg %p5091_p1 }
  0x8b   : > { %s3749_s7 = scalar_lea.hbm %s5090_s2, 256 }
  0x8c   : > { %p3750_p3 = scmp.ne.s32.totalorder %s5090_s2, %s3749_s7  ;;  %p3756_p0 = scmp.lt.u32.totalorder %s3749_s7, %s5090_s2 }
  0x8e   : > { %p3752_p6 = pnand %p3750_p3, %p5092_p4 }
  0x90   : > { %p3753_p10 = pneg %p3752_p6 }
  0x92   : > { %p3758_p7 = pnand %p3756_p0, %p3753_p10 }
  0x94   : > { %3761 = shalt.err (!%p3758_p7)
}
  0x95   : > { %s3762_s12 = scalar_lea.vmem %s301_s28, 256  ;;  %p5093_p12 = pmov %p5092_p4 }
  0x96   : > { %p3763_p9 = scmp.ne.s32.totalorder %s301_s28, %s3762_s12  ;;  %p3770_p11 = scmp.lt.s32.totalorder %s301_s28, %s301_s28 }
  0x97   : > { %p3771_p8 = scmp.lt.s32.totalorder %s3762_s12, %s3762_s12 }
  0x98   : > { %p3765_p2 = pnand %p3763_p9, %p5093_p12 }
  0x99   : > { %p3772_p13 = por %p3771_p8, %p3770_p11 }
  0x9a   : > { %p3766_p5 = pneg %p3765_p2 }
  0x9c   : > { %p3773_p3 = pnand %p3772_p13, %p3766_p5 }
  0x9e   : > { %3776 = shalt.err (!%p3773_p3)
}
  0x9f   : > { %3312 = dma.hbm_to_vmem [thread:$0]  (!%p5091_p1), %s5090_s2, 256, %s301_s28, [#allocation7], %s5053_s8, %s5053_s8, %s5054_s25  }
  0xa0   : > { %s43_s24 = sadd.s32 1, %s4027_s13  ;;  %s46_s19 = sadd.s32 1, %s4031_s14 }
  0xa1   : > { %p44_p8 = scmp.ge.s32.totalorder %s43_s24, 2  ;;  %s53_s1 = sadd.s32 1, %s4015_s10 }
  0xa2   : > { %p60_p13 = scmp.ne.s32.totalorder %s4015_s10, %s4011_s9  ;;  %p5095_p4 = scmp.eq.s32.totalorder %s4035_s15, 0 }
  0xa3   : > { %s5144_s24 = smov (%p44_p8, %s43_s24), 0  ;;  %s5146_s19 = smov (!%p44_p8, %s46_s19), %s4031_s14 }
  0xa4   : > { %5094 = sst [smem:[#allocation32_spill]] %s5144_s24  ;;  %p4363_p6 = por %p5095_p4, %p60_p13 }
  0xa5   : > { %s118_s18 = ssub.s32 %s4027_s13, %s5144_s24  ;;  %p48_p1 = scmp.ge.s32.totalorder %s5146_s19, 2 }
  0xa6   : > { %p119_p10 = scmp.eq.s32.totalorder %s118_s18, 0  ;;  %p5097_p0 = scmp.eq.s32.totalorder %s4160_s16, 3 }
  0xa7   : > { %s314_s7 = sand.u32 1, %s4015_s10   ;;  %s5148_s19 = smov (%p48_p1, %s5146_s19), 0 }
  0xa8   : > { %p4371_p7 = por %p5097_p0, %p60_p13  ;;  %5100 = sst [smem:[#allocation34_spill]] %s5148_s19 }
  0xa9   : > { %s5101_s3 = sadd.s32 1, %s4003_s29  ;;  %s50_s12 = ssub.s32 %s4031_s14, %s5148_s19 }
  0xaa   : > { %s5098_s28 = scalar_select %p4371_p7, 1, 0 }
  0xab   : > { %s4381_s22 = scalar_select %p119_p10, %s4003_s29, %s5101_s3  }
  0xac   : > { %5099 = sst [smem:[#allocation33_spill]] %s5098_s28  ;;  %p51_p9 = scmp.eq.s32.totalorder %s50_s12, 0 }
  0xad   : > { %s2927_s5 = sshll.u32 %s314_s7, 5  ;;  %s3043_s6 = sshll.u32 %s4031_s14, 9 }
  0xae   : > { %s4387_s8 = scalar_select %p51_p9, %s4015_s10, %s53_s1  }
  0xaf   : > { %s4392_s2 = scalar_lea.hbm %s5015_s0, %s3043_s6  ;;  %s318_s24 = scalar_lea.vmem [#allocation3], %s2927_s5 }
  0xb0   : > { %s326_s28 = sshll.u32 %s318_s24, 4  ;;  %p5102_p12 = scmp.lt.s32.totalorder %s4035_s15, 4  ;;  %s4394_s28 = int_to_ptr.vmem [resolvable:$true] %s326_s28 }
  0xb1   : > { %s2932_s1 = sshll.u32 %s4232_s17, 6  ;;  %s3044_s25 = sshll.u32 %s4027_s13, 10 }
  0xb2   : > { %p4400_p2 = pnand %p5102_p12, %p4363_p6  ;;  %s4406_s12 = scalar_lea.sflag [#allocation4], %s314_s7 }
  0xb3   : > { %s3777_s6 = scalar_lea.hbm %s4392_s2, 512  ;;  %s3782_s5 = scalar_lea.hbm %s5015_s0, 1024 }
  0xb4   : > { %p3778_p5 = scmp.ne.s32.totalorder %s4392_s2, %s3777_s6  ;;  %p3779_p11 = pneg %p4400_p2 }
  0xb5   : > { %p3783_p13 = scmp.lt.u32.totalorder %s4392_s2, %s5015_s0  ;;  %p3784_p4 = scmp.lt.u32.totalorder %s3782_s5, %s3777_s6 }
  0xb6   : > { %p3780_p3 = pnand %p3779_p11, %p3778_p5  ;;  %p3786_p1 = scmp.lt.u32.totalorder %s3777_s6, %s4392_s2 }
  0xb7   : > { %p3785_p6 = por %p3784_p4, %p3783_p13 }
  0xb8   : > { %p3781_p8 = pneg %p3780_p3 }
  0xb9   : > { %p3787_p10 = por %p3786_p1, %p3785_p6 }
  0xbb   : > { %p3788_p0 = pnand %p3787_p10, %p3781_p8 }
  0xbd   : > { %3791 = shalt.err (!%p3788_p0)
}
  0xbe   : > { %s3792_s7 = scalar_lea.vmem %s4394_s28, 512  ;;  %s4047_s24 = smov [#allocation3]  }
  0xbf   : > { %p3793_p9 = scmp.ne.s32.totalorder %s4394_s28, %s3792_s7  ;;  %s3797_s21 = sshll.u32 %s4047_s24, 4  ;;  %s3798_s21 = int_to_ptr.vmem [resolvable:$false] %s3797_s21 }
  0xc0   : > { %s3799_s19 = scalar_lea.vmem %s3798_s21, 1024  ;;  %p3800_p3 = scmp.lt.s32.totalorder %s4394_s28, %s3798_s21 }
  0xc1   : > { %p3795_p12 = pnand %p3793_p9, %p3779_p11  ;;  %p3801_p13 = scmp.lt.s32.totalorder %s3799_s19, %s3792_s7 }
  0xc3   : > { %p3796_p5 = pneg %p3795_p12  ;;  %p3802_p4 = por %p3801_p13, %p3800_p3 }
  0xc5   : > { %p3803_p6 = pnand %p3802_p4, %p3796_p5 }
  0xc7   : > { %3806 = shalt.err (!%p3803_p6)
}
  0xc8   : > { %s5104_s6 = smov 8   ;;  %s5105_s5 = smov 128  }
  0xc9   : > { %3316 = dma.hbm_to_vmem [thread:$0]  (!%p4400_p2), %s4392_s2, 512, %s4394_s28, %s4406_s12, %s5105_s5, %s5105_s5, %s5104_s6  }
  0xca   : > { %s4442_s7 = scalar_lea.hbm %s5019_s4, %s3044_s25  ;;  %s361_s3 = scalar_lea.vmem [#allocation11], %s2932_s1 }
  0xcb   : > { %s368_s21 = sshll.u32 %s361_s3, 4  ;;  %s3807_s19 = scalar_lea.hbm %s4442_s7, 1024  ;;  %s4446_s21 = int_to_ptr.vmem [resolvable:$true] %s368_s21 }
  0xcc   : > { %p3808_p11 = scmp.ne.s32.totalorder %s4442_s7, %s3807_s19  ;;  %p5106_p8 = scmp.ne.s32.totalorder %s5085_s26, 0 }
  0xcd   : > { %s3812_s12 = scalar_lea.hbm %s5019_s4, 2048  ;;  %p3813_p10 = scmp.lt.u32.totalorder %s4442_s7, %s5019_s4 }
  0xce   : > { %p3810_p1 = pnand %p3808_p11, %p5106_p8  ;;  %p3814_p0 = scmp.lt.u32.totalorder %s3812_s12, %s3807_s19 }
  0xcf   : > { %p3816_p12 = scmp.lt.u32.totalorder %s3807_s19, %s4442_s7 }
  0xd0   : > { %p3811_p2 = pneg %p3810_p1  ;;  %p3815_p9 = por %p3814_p0, %p3813_p10 }
  0xd2   : > { %p3817_p5 = por %p3816_p12, %p3815_p9 }
  0xd4   : > { %p3818_p3 = pnand %p3817_p5, %p3811_p2 }
  0xd6   : > { %3821 = shalt.err (!%p3818_p3)
}
  0xd7   : > { %s3822_s1 = scalar_lea.vmem %s4446_s21, 1024  ;;  %s4048_s5 = smov [#allocation11]  }
  0xd8   : > { %p3823_p13 = scmp.ne.s32.totalorder %s4446_s21, %s3822_s1  ;;  %s3827_s18 = sshll.u32 %s4048_s5, 4  ;;  %s3828_s18 = int_to_ptr.vmem [resolvable:$false] %s3827_s18 }
  0xd9   : > { %s3829_s24 = scalar_lea.vmem %s3828_s18, 2048  ;;  %p3830_p11 = scmp.lt.s32.totalorder %s4446_s21, %s3828_s18 }
  0xda   : > { %p3825_p4 = pnand %p3823_p13, %p5106_p8  ;;  %p3831_p1 = scmp.lt.s32.totalorder %s3829_s24, %s3822_s1 }
  0xdc   : > { %p3826_p6 = pneg %p3825_p4  ;;  %p3832_p10 = por %p3831_p1, %p3830_p11 }
  0xde   : > { %p3833_p0 = pnand %p3832_p10, %p3826_p6 }
  0xe0   : > { %3836 = shalt.err (!%p3833_p0)
}
  0xe1   : > { %p5107_p2 = scmp.ne.s32.totalorder %s5083_s11, 0  ;;  %s5108_s3 = smov 4  }
  0xe2   : > { %s5109_s19 = smov 64   ;;  %s3837_s2 = scalar_lea.hbm %s4295_s23, 2048 }
  0xe3   : > { %3322 = dma.hbm_to_vmem [thread:$0]  (!%p5107_p2), %s4442_s7, 1024, %s4446_s21, %s4251_s20, %s5109_s19, %s5109_s19, %s5108_s3  }
  0xe4   : > { %p3838_p9 = scmp.ne.s32.totalorder %s4295_s23, %s3837_s2  ;;  %s5110_s25 = sld [smem:[#allocation39_spill]] }
  0xe5   : > { %p3846_p6 = scmp.lt.u32.totalorder %s3837_s2, %s4295_s23 }
  0xe6   : > { %p3840_p12 = pnand %p3838_p9, %p5106_p8 }
  0xe8   : > { %p3841_p5 = pneg %p3840_p12 }
  0xea   : > { %s3842_s6 = scalar_lea.hbm %s5110_s25, 4096  ;;  %p3843_p3 = scmp.lt.u32.totalorder %s4295_s23, %s5110_s25 }
  0xeb   : > { %p3844_p13 = scmp.lt.u32.totalorder %s3842_s6, %s3837_s2 }
  0xed   : > { %p3845_p4 = por %p3844_p13, %p3843_p3 }
  0xef   : > { %p3847_p11 = por %p3846_p6, %p3845_p4 }
  0xf1   : > { %p3848_p1 = pnand %p3847_p11, %p3841_p5 }
  0xf3   : > { %3851 = shalt.err (!%p3848_p1)
}
  0xf4   : > { %s3852_s20 = scalar_lea.vmem %s4328_s27, 2048  ;;  %s4049_s7 = smov [#allocation14]  }
  0xf5   : > { %p3853_p10 = scmp.ne.s32.totalorder %s4328_s27, %s3852_s20  ;;  %s3857_s21 = sshll.u32 %s4049_s7, 4  ;;  %s3858_s21 = int_to_ptr.vmem [resolvable:$false] %s3857_s21 }
  0xf6   : > { %s3859_s18 = scalar_lea.vmem %s3858_s21, 4096  ;;  %p3860_p12 = scmp.lt.s32.totalorder %s4328_s27, %s3858_s21 }
  0xf7   : > { %p3855_p0 = pnand %p3853_p10, %p5106_p8  ;;  %p3861_p7 = scmp.lt.s32.totalorder %s3859_s18, %s3852_s20 }
  0xf9   : > { %p3856_p9 = pneg %p3855_p0  ;;  %p3862_p3 = por %p3861_p7, %p3860_p12 }
  0xfb   : > { %p3863_p13 = pnand %p3862_p3, %p3856_p9 }
  0xfd   : > { %3866 = shalt.err (!%p3863_p13)
}
  0xfe   : > { %3328 = dma.hbm_to_vmem [thread:$0]  (!%p5107_p2), %s4295_s23, 2048, %s4328_s27, %s4299_s30, %s5109_s19, %s5109_s19, %s5108_s3  }
  0xff   : > { %s3280_s24 = smul.u32 24, %s4232_s17  ;;  %s5111_s25 = sld [smem:[#allocation40_spill]] }
 0x100   : > { %s3281_s2 = smul.u32 384, %s4027_s13  ;;  %s421_s20 = scalar_lea.sflag [#allocation16], %s4232_s17 }
 0x101   : > { %s424_s1 = scalar_lea.vmem [#allocation15], %s3280_s24 }
 0x102   : > { %s432_s5 = sshll.u32 %s424_s1, 4  ;;  %s433_s5 = int_to_ptr.vmem [resolvable:$true] %s432_s5 }
 0x105   : > { %s4503_s6 = scalar_lea.hbm %s5111_s25, %s3281_s2  ;;  %s3872_s27 = scalar_lea.hbm %s5111_s25, 768 }
 0x106   : > { %s3867_s7 = scalar_lea.hbm %s4503_s6, 384  ;;  %p3873_p6 = scmp.lt.u32.totalorder %s4503_s6, %s5111_s25 }
 0x107   : > { %p3868_p7 = scmp.ne.s32.totalorder %s4503_s6, %s3867_s7  ;;  %p3874_p11 = scmp.lt.u32.totalorder %s3872_s27, %s3867_s7 }
 0x108   : > { %p3876_p10 = scmp.lt.u32.totalorder %s3867_s7, %s4503_s6 }
 0x109   : > { %p3870_p5 = pnand %p3868_p7, %p5106_p8  ;;  %p3875_p1 = por %p3874_p11, %p3873_p6 }
 0x10b   : > { %p3871_p4 = pneg %p3870_p5  ;;  %p3877_p0 = por %p3876_p10, %p3875_p1 }
 0x10d   : > { %p3878_p9 = pnand %p3877_p0, %p3871_p4 }
 0x10f   : > { %3881 = shalt.err (!%p3878_p9)
}
 0x110   : > { %s3882_s17 = scalar_lea.vmem %s433_s5, 384  ;;  %s4050_s21 = smov [#allocation15]  }
 0x111   : > { %p3883_p12 = scmp.ne.s32.totalorder %s433_s5, %s3882_s17  ;;  %s3887_s18 = sshll.u32 %s4050_s21, 4  ;;  %s3888_s18 = int_to_ptr.vmem [resolvable:$false] %s3887_s18 }
 0x112   : > { %s3889_s24 = scalar_lea.vmem %s3888_s18, 768  ;;  %p3890_p7 = scmp.lt.s32.totalorder %s433_s5, %s3888_s18 }
 0x113   : > { %p3885_p3 = pnand %p3883_p12, %p5106_p8  ;;  %p3891_p5 = scmp.lt.s32.totalorder %s3889_s24, %s3882_s17 }
 0x115   : > { %p3886_p13 = pneg %p3885_p3  ;;  %p3892_p2 = por %p3891_p5, %p3890_p7 }
 0x117   : > { %p3893_p6 = pnand %p3892_p2, %p3886_p13 }
 0x119   : > { %3896 = shalt.err (!%p3893_p6)
}
 0x11a   : > { %p5112_p11 = scmp.ne.s32.totalorder %s5083_s11, 0  ;;  %s5113_s2 = sld [smem:[#allocation31_spill]] }
 0x11c   : > { %3331 = dma.hbm_to_vmem [thread:$0]  (!%p5112_p11), %s4503_s6, 384, %s433_s5, %s421_s20  }
 0x120   : > { %p5114_p4 = scmp.ne.s32.totalorder %s5113_s2, 0 }
 0x121   : > { %s5115_s26 = sld [smem:[#allocation28_spill]] (!%p5114_p4)  ;;  %s4526_s28 = sand.u32 (!%p5114_p4), 1, %s4011_s9  }
 0x122   : > { %441 = sbr.rel (%p5114_p4) target bundleno = 4735 (0x127f), region = 52  ;;  %s2943_s12 = sshll.u32 (!%p5114_p4), %s4526_s28, 5 }
 0x123   : > { %s444_s1 = scalar_lea.sflag (!%p5114_p4), [#allocation4], %s4526_s28  ;;  %s4530_s7 = scalar_lea.vmem (!%p5114_p4), [#allocation3], %s2943_s12 }
 0x127   : > { %p5116_p8 = scmp.ne.s32.totalorder (!%p5114_p4), %s5115_s26, 0 }
 0x129   : > { %3970 = dma.done.wait (%p5116_p8), %s444_s1, 512  }
 0x12a   : > { %3972 = vsyncadd (%p5116_p8), %s444_s1, 4294966784  ;;  %p5117_p2 = scmp.eq.s32.totalorder %s4160_s16, 0 }
 0x12c   : > { %3974 = dma.done.wait (%p5117_p2), [#allocation7], 448   ;;  %p5118_p1 = pmov %p5117_p2 }
 0x12d   : > { %s5119_s11 = sld [smem:[#allocation24_spill]]  ;;  %s5120_s6 = sld [smem:[#allocation29_spill]] }
 0x12e   : > { %3976 = vsyncadd (%p5118_p1), [#allocation7], 4294966848  ;;  %s460_s5 = sand.u32 1, %s4160_s16  }
 0x12f   : > { %s461_s30 = scalar_lea.sflag [#allocation10], %s460_s5 }
 0x133   : > { %s462_s20 = sand.u32 1, %s5119_s11   ;;  %p5121_p10 = scmp.ne.s32.totalorder %s5120_s6, 0 }
 0x134   : > { %s3282_s23 = smul.u32 192, %s462_s20 }
 0x136   : > { %s4542_s27 = scalar_lea.vmem [#allocation9], %s3282_s23 }
 0x137   : > { %3978 = dma.done.wait (%p5121_p10), %s461_s30, 4096  }
 0x138   : > { %3980 = vsyncadd (%p5121_p10), %s461_s30, 4294963200  ;;  %s2946_s3 = sshll.u32 %s462_s20, 6  ;;  %s2947_s19 = sshll.u32 %s462_s20, 7 }
 0x139   : > { %s4548_s17 = scalar_lea.vmem [#allocation11], %s2946_s3  ;;  %s479_s21 = scalar_lea.sflag [#allocation13], %s460_s5 }
 0x13a   : > { %s4550_s18 = scalar_lea.vmem [#allocation12], %s2947_s19 }
 0x13b   : > { %3982 = dma.done.wait (%p5121_p10), %s479_s21, 4096  }
 0x13c   : > { %3984 = vsyncadd (%p5121_p10), %s479_s21, 4294963200  ;;  %s3283_s16 = smul.u32 24, %s462_s20  ;;  %s4556_s24 = scalar_lea.vmem [#allocation14], %s2947_s19 }
 0x13d   : > { %s497_s2 = scalar_lea.sflag [#allocation16], %s462_s20 }
 0x13e   : > { %s4558_s26 = scalar_lea.vmem [#allocation15], %s3283_s16 }
 0x13f   : > { %3986 = dma.done.wait (%p5121_p10), %s497_s2, 384  }
 0x140   : > { %3988 = vsyncadd (%p5121_p10), %s497_s2, 4294966912  ;;  %s4564_s1 = scalar_lea.vmem [#allocation17], %s2943_s12  ;;  %s5122_s11 = sld [smem:[#allocation26_spill]] }
 0x146   : > { %p2950_p0 = scmp.ne.s32.totalorder %s5122_s11, 0 }
 0x147   : > { %v3447_v0 = vld [vmem:[#allocation6] sm:$0xff] (!%p2950_p0)   ;;  %vm590_vm0 = vcmask (!%p2950_p0), 1041408   ;;  %v3448_v1 = vld [vmem:[#allocation6 + $0x8] ss:$0 sps:$4 sm:$0x33] (!%p2950_p0)   ;;  %vm583_vm1 = vcmask (!%p2950_p0), 162816  }
 0x148   : > { %564 = sbr.rel (%p2950_p0) target bundleno = 554 (0x22a), region = 88  ;;  %v565_v2 = vld [vmem:[%s4530_s7] sm:$0xff] (!%p2950_p0)  ;;  %3133 = vmatprep.subr.bf16.mxu0 (!%p2950_p0), %v3447_v0  ;;  %v566_v3 = vld [vmem:[%s4530_s7 + $0x8] sm:$0xff] (!%p2950_p0)  ;;  %v567_v5 = vld [vmem:[%s4530_s7 + $0x10] sm:$0xff] (!%p2950_p0)  ;;  %v592_v7 = vsel (!%p2950_p0), %vm590_vm0, %v3448_v1, 0 }
 0x149   : > { %3134 = vmatpush3.bf16.msra.mxu0 (!%p2950_p0), %v3447_v0  ;;  %v569_v4 = vpack.c.bf16 (!%p2950_p0), %v566_v3, %v565_v2  ;;  %v568_v6 = vld [vmem:[%s4530_s7 + $0x18] sm:$0xff] (!%p2950_p0)  ;;  %v643_v9 = vld [vmem:[#allocation8] sm:$0xff] (!%p2950_p0) }
 0x14a   : > { %3277 = vmatprep.subr.msk.bf16.mxu0 (!%p2950_p0), %vm590_vm0, %v3448_v1  ;;  %v570_v8 = vpack.c.bf16 (!%p2950_p0), %v568_v6, %v567_v5  ;;  %v644_v11 = vld [vmem:[#allocation8 + $0x8] sm:$0xff] (!%p2950_p0) }
 0x14b   : > { %3137 = vmatprep.mubr.msk.bf16.mxu0 (!%p2950_p0), %vm583_vm1, %v569_v4 }
 0x14d   : > { %3136 = vmatpush3.bf16.msra.mxu0 (!%p2950_p0), %v592_v7 }
 0x150   : > { %3138 = vmatmul.mubr.msk.bf16.vlgmr.msra.gmra.mrb[0].mxu0 %vm583_vm1, %v570_v8 }
 0x223   : > { %v3139_v10 = vpop.f32.mrb[0].mxu0 }
 0x224   : > { %v647_v12 = vadd.f32 %v3139_v10, %v643_v9  ;;  %v628_v13 = vpop.f32.mrb[1].mxu0 }
 0x225   : > { %v645_v14 = vadd.f32 %v643_v9, %v628_v13  ;;  %v3140_v15 = vpop.f32.mrb[2].mxu0 }
 0x226   : > { %651 = vst [vmem:[#allocation2 + $0x10] sm:$0xff] %v647_v12  ;;  %v648_v16 = vadd.f32 %v3140_v15, %v644_v11  ;;  %v631_v17 = vpop.f32.mrb[3].mxu0 }
 0x227   : > { %649 = vst [vmem:[#allocation2] sm:$0xff] %v645_v14  ;;  %v646_v18 = vadd.f32 %v644_v11, %v631_v17 }
 0x228   : > { %652 = vst [vmem:[#allocation2 + $0x18] sm:$0xff] %v648_v16 }
 0x229   : > { %650 = vst [vmem:[#allocation2 + $0x8] sm:$0xff] %v646_v18 }
 0x22a PF: > { %v3479_v19 = vld [vmem:[%s4542_s27 + $0x4] ss:$12 sps:$4 sm:$0xff]   ;;  %v3481_v20 = vld [vmem:[%s4542_s27] ss:$12 sps:$4 sm:$0xff]   ;;  %v4051_v21 = vmov 0   ;;  %v4052_v42 = vmov 0.0   ;;  %v694_v43 = vlaneseq }
 0x22b   : > { %866 = vmatprep.mubr.bf16.mxu0 %v4051_v21  ;;  %834 = vmatprep.subr.bf16.mxu0 %v3479_v19  ;;  %v3482_v22 = vld [vmem:[%s4542_s27 + $0x1c] ss:$12 sps:$4 sm:$0xff]   ;;  %v3484_v23 = vld [vmem:[%s4542_s27 + $0x18] ss:$12 sps:$4 sm:$0xff]   ;;  %v3485_v24 = vld [vmem:[%s4542_s27 + $0x34] ss:$12 sps:$4 sm:$0xff]  }
 0x22c   : > { %835 = vmatpush1.bf16.msra.mxu0 %v3481_v20  ;;  %v3487_v25 = vld [vmem:[%s4542_s27 + $0x30] ss:$12 sps:$4 sm:$0xff]   ;;  %v3488_v26 = vld [vmem:[%s4542_s27 + $0x4c] ss:$12 sps:$4 sm:$0xff]   ;;  %v3490_v28 = vld [vmem:[%s4542_s27 + $0x48] ss:$12 sps:$4 sm:$0xff]  }
 0x22d   : > { %836 = vmatprep.subr.bf16.mxu0 %v3482_v22  ;;  %v3491_v30 = vld [vmem:[%s4542_s27 + $0x64] ss:$12 sps:$4 sm:$0xff]   ;;  %v3493_v32 = vld [vmem:[%s4542_s27 + $0x60] ss:$12 sps:$4 sm:$0xff]   ;;  %v3494_v33 = vld [vmem:[%s4542_s27 + $0x7c] ss:$12 sps:$4 sm:$0xff]  }
 0x22e   : > { %v653_v27 = vld [vmem:[#allocation2] sm:$0xff]  ;;  %v3497_v35 = vld [vmem:[%s4542_s27 + $0x94] ss:$12 sps:$4 sm:$0xff]   ;;  %v3499_v36 = vld [vmem:[%s4542_s27 + $0x90] ss:$12 sps:$4 sm:$0xff]   ;;  %vm4053_vm2 = vmmov 0  }
 0x22f   : > { %v3496_v34 = vld [vmem:[%s4542_s27 + $0x78] ss:$12 sps:$4 sm:$0xff]   ;;  %v3502_v38 = vld [vmem:[%s4542_s27 + $0xa8] ss:$12 sps:$4 sm:$0xff]   ;;  %v656_v40 = vld [vmem:[#allocation2 + $0x18] sm:$0xff]  ;;  %v4596_v44 = vshrl.u32 %v694_v43, 7 }
 0x230   : > { %837 = vmatpush1.bf16.msra.mxu0 %v3484_v23  ;;  %v654_v29 = vld [vmem:[#allocation2 + $0x8] sm:$0xff]  ;;  %v655_v39 = vld [vmem:[#allocation2 + $0x10] sm:$0xff]  ;;  %vm946_vm3 = vcmask 261120   ;;  %v937_v16 = vand.u32 127, %v694_v43  ;;  %v4054_v17 = vmov -1e+30  }
 0x231   : > { %838 = vmatprep.subr.bf16.mxu0 %v3485_v24  ;;  %v660_v31 = vpack.c.bf16 %v654_v29, %v653_v27  ;;  %v3500_v37 = vld [vmem:[%s4542_s27 + $0xac] ss:$12 sps:$4 sm:$0xff]   ;;  %v4589_v41 = vpack.c.bf16 %v656_v40, %v655_v39  ;;  %v4599_v45 = vsub.s32 0, %v4596_v44  ;;  %v3503_v8 = vld [vmem:[%s4542_s27 + $0x8] ss:$12 sps:$4 sm:$0xff]   ;;  %vm1049_vm5 = vcmask 130048  }
 0x232   : > { %v657_v46 = vld [vmem:[%s4558_s26] sm:$0xff]  ;;  %v658_v47 = vld [vmem:[%s4558_s26 + $0x8] sm:$0xff]  ;;  %3141 = vmatprep.subr.bf16.mxu1 %v3503_v8  ;;  %vm938_vm4 = vcmp.lt.s32.totalorder %v937_v16, 14  ;;  %s4055_s12 = smov 96   ;;  %s4056_s7 = smov 64   ;;  %vm2040_vm6 = vcmask 523264  }
 0x233   : > { %3157 = vmatprep.mubr.bf16.mxu1 %v660_v31  ;;  %v697_v48 = vrot.slane %v657_v46, %v4599_v45  ;;  %v701_v50 = vrot.slane %v658_v47, %v4599_v45  ;;  %v3504_v9 = vld [vmem:[%s4542_s27 + $0x20] ss:$12 sps:$4 sm:$0xff]   ;;  %3142 = vmatpush3.bf16.msra.mxu1 %v3503_v8  ;;  %v3505_v10 = vld [vmem:[%s4542_s27 + $0x38] ss:$12 sps:$4 sm:$0xff]   ;;  %v3506_v11 = vld [vmem:[%s4542_s27 + $0x50] ss:$12 sps:$4 sm:$0xff]  }
 0x234   : > { %839 = vmatpush1.bf16.msra.mxu0 %v3487_v25  ;;  %3143 = vmatprep.subr.bf16.mxu1 %v3504_v9  ;;  %v3507_v12 = vld [vmem:[%s4542_s27 + $0x68] ss:$12 sps:$4 sm:$0xff]   ;;  %v3508_v13 = vld [vmem:[%s4542_s27 + $0x80] ss:$12 sps:$4 sm:$0xff]   ;;  %v3509_v14 = vld [vmem:[%s4542_s27 + $0x98] ss:$12 sps:$4 sm:$0xff]  }
 0x235   : > { %840 = vmatprep.subr.bf16.mxu0 %v3488_v26  ;;  %v3510_v15 = vld [vmem:[%s4542_s27 + $0xb0] ss:$12 sps:$4 sm:$0xff]   ;;  %v4640_v18 = vsel %vm938_vm4, 0.0, %v4054_v17  ;;  %s4057_s6 = smov 32   ;;  %vm2045_vm7 = vcmask 785408   ;;  %s5123_s5 = sld [smem:[#allocation26_spill]] }
 0x237   : > { %3144 = vmatpush3.bf16.msra.mxu1 %v3504_v9 }
 0x238   : > { %841 = vmatpush1.bf16.msra.mxu0 %v3490_v28  ;;  %3145 = vmatprep.subr.bf16.mxu1 %v3505_v10 }
 0x239   : > { %842 = vmatprep.subr.bf16.mxu0 %v3491_v30 }
 0x23b   : > { %3146 = vmatpush3.bf16.msra.mxu1 %v3505_v10  ;;  %p3035_p9 = scmp.ne.s32.totalorder %s5123_s5, 1 }
 0x23c   : > { %843 = vmatpush1.bf16.msra.mxu0 %v3493_v32  ;;  %3147 = vmatprep.subr.bf16.mxu1 %v3506_v11 }
 0x23d   : > { %844 = vmatprep.subr.bf16.mxu0 %v3494_v33 }
 0x23f   : > { %3148 = vmatpush3.bf16.msra.mxu1 %v3506_v11 }
 0x240   : > { %845 = vmatpush1.bf16.msra.mxu0 %v3496_v34  ;;  %3149 = vmatprep.subr.bf16.mxu1 %v3507_v12 }
 0x241   : > { %846 = vmatprep.subr.bf16.mxu0 %v3497_v35 }
 0x243   : > { %3150 = vmatpush3.bf16.msra.mxu1 %v3507_v12 }
 0x244   : > { %847 = vmatpush1.bf16.msra.mxu0 %v3499_v36  ;;  %3151 = vmatprep.subr.bf16.mxu1 %v3508_v13 }
 0x245   : > { %848 = vmatprep.subr.bf16.mxu0 %v3500_v37 }
 0x247   : > { %3152 = vmatpush3.bf16.msra.mxu1 %v3508_v13 }
 0x248   : > { %849 = vmatpush1.bf16.msra.mxu0 %v3502_v38  ;;  %3153 = vmatprep.subr.bf16.mxu1 %v3509_v14 }
 0x249   : > { %3161 = vmatprep.subr.bf16.mxu0 %v4052_v42 }
 0x24b   : > { %867 = vmatmul.mubr.bf16.vlgmr.msra.gmra.mrb[0].mxu0 %v660_v31  ;;  %3154 = vmatpush3.bf16.msra.mxu1 %v3509_v14 }
 0x24c   : > { %876 = vmatprep.mubr.bf16.mxu0 %v4051_v21  ;;  %3155 = vmatprep.subr.bf16.mxu1 %v3510_v15 }
 0x24f   : > { %3156 = vmatpush3.bf16.msra.mxu1 %v3510_v15 }
 0x250   : > { %3173 = vmatprep.subr.bf16.mxu1 %v4052_v42 }
 0x252   : > { %3158 = vmatmul.mubr.bf16.vlgmr.msra.gmra.mrb[0].mxu1 %v4589_v41 }
 0x253   : > { %877 = vmatmul.mubr.bf16.gmra.mrb[4].mxu0 %v4589_v41  ;;  %3175 = vmatprep.mubr.msk.bf16.mxu1 %vm4053_vm2, %v4052_v42 }
 0x254   : > { %3163 = vmatprep.mubr.msk.bf16.mxu0 %vm4053_vm2, %v4052_v42 }
 0x31e   : > { %v868_v49 = vpop.f32.mrb[0].mxu0 }
 0x31f   : > { %v870_v51 = vpop.f32.mrb[1].mxu0  ;;  %v869_v53 = vadd.f32 %v868_v49, %v697_v48 }
 0x320   : > { %v872_v52 = vpop.f32.mrb[2].mxu0  ;;  %v871_v56 = vadd.f32 %v870_v51, %v701_v50 }
 0x321   : > { %v873_v54 = vadd.f32 %v872_v52, %v697_v48  ;;  %v874_v55 = vpop.f32.mrb[3].mxu0 }
 0x322   : > { %v875_v57 = vadd.f32 %v874_v55, %v701_v50 }
 0x323   : > { %v4605_v58 = vpack.c.bf16 %v873_v54, %v869_v53 }
 0x324   : > { %v4607_v59 = vpack.c.bf16 %v875_v57, %v871_v56 }
 0x326   : > { %v878_v60 = vpop.f32.mrb[4].mxu0  ;;  %v951_v61 = vsel %vm946_vm3, %v4607_v59, 0 }
 0x327   : > { %v879_v62 = vadd.f32 %v878_v60, %v697_v48  ;;  %v880_v63 = vpop.f32.mrb[5].mxu0  ;;  %3162 = vmatpush3.bf16.xpose.msra.mxu0 %v951_v61 }
 0x328   : > { %v881_v0 = vadd.f32 %v880_v63, %v701_v50  ;;  %v882_v1 = vpop.f32.mrb[6].mxu0  ;;  %3167 = vmatprep.subr.bf16.mxu0 %v4052_v42 }
 0x329   : > { %v883_v2 = vadd.f32 %v882_v1, %v697_v48  ;;  %v884_v3 = vpop.f32.mrb[7].mxu0  ;;  %v3159_v1 = vpop.f32.mrb[0].mxu1 }
 0x32a   : > { %v885_v4 = vadd.f32 %v884_v3, %v701_v50  ;;  %v921_v3 = vpop.f32.mrb[1].mxu1 }
 0x32b   : > { %v4612_v5 = vpack.c.bf16 %v883_v2, %v879_v62  ;;  %v659_v2 = vld [vmem:[%s4558_s26 + $0x10] sm:$0xff] }
 0x32c   : > { %v4614_v6 = vpack.c.bf16 %v885_v4, %v881_v0  ;;  %v705_v4 = vrot.slane %v659_v2, %v4599_v45 }
 0x32e   : > { %3164 = vmatmul.mubr.msk.bf16.vlgmr.msra.gmra.mrb[8].mxu0 %vm946_vm3, %v4605_v58  ;;  %v998_v7 = vsel %vm946_vm3, %v4614_v6, 0  ;;  %v930_v9 = vadd.f32 %v3159_v1, %v705_v4  ;;  %v922_v10 = vadd.f32 %v921_v3, %v705_v4 }
 0x32f   : > { %3168 = vmatpush3.bf16.xpose.msra.mxu0 %v998_v7  ;;  %3169 = vmatprep.mubr.msk.bf16.mxu0 %vm4053_vm2, %v4052_v42  ;;  %v3160_v7 = vpop.f32.mrb[2].mxu1 }
 0x330   : > { %3179 = vmatprep.subr.bf16.mxu0 %v4052_v42  ;;  %v924_v8 = vpop.f32.mrb[3].mxu1  ;;  %v933_v11 = vadd.f32 %v3160_v7, %v705_v4 }
 0x331   : > { %v925_v12 = vadd.f32 %v924_v8, %v705_v4 }
 0x332   : > { %v4656_v13 = vpack.c.bf16 %v933_v11, %v930_v9 }
 0x333   : > { %v4658_v14 = vpack.c.bf16 %v925_v12, %v922_v10 }
 0x335   : > { %3174 = vmatpush3.bf16.msra.mxu1 %v4658_v14 }
 0x336   : > { %3170 = vmatmul.mubr.msk.bf16.vlgmr.msra.gmra.mrb[12].mxu0 %vm946_vm3, %v4612_v5  ;;  %3185 = vmatprep.subr.bf16.mxu1 %v4052_v42 }
 0x337   : > { %3181 = vmatprep.mubr.msk.bf16.mxu0 %vm4053_vm2, %v4052_v42  ;;  %3180 = vmatpush3.bf16.msra.mxu0 %v4656_v13 }
 0x338   : > { %3191 = vmatprep.subr.bf16.mxu0 %v4052_v42 }
 0x401   : > { %v987_v19 = vpop.f32.mrb[8].mxu0 }
 0x402   : > { %v1041_v20 = vmul.f32 0.17677669, %v987_v19  ;;  %v3165_v22 = vpop.f32.mrb[9].mxu0 }
 0x403   : > { %v990_v23 = vpop.f32.mrb[10].mxu0 }
 0x404   : > { %v1042_v24 = vmul.f32 0.17677669, %v990_v23  ;;  %v3166_v25 = vpop.f32.mrb[11].mxu0  ;;  %v1045_v26 = vadd.f32 %v1041_v20, %v4640_v18 }
 0x406   : > { %v1050_v27 = vsel %vm1049_vm5, %v1045_v26, -inf  ;;  %v1046_v28 = vadd.f32 %v1042_v24, %v4640_v18 }
 0x407   : > { %1051 = vmax.xlane.f32.xlu0 %v1050_v27 }
 0x408   : > { %v1053_v32 = vsel %vm1049_vm5, %v1046_v28, -inf }
 0x409   : > { %v1034_v29 = vpop.f32.mrb[12].mxu0 }
 0x40a   : > { %v1043_v30 = vmul.f32 0.17677669, %v1034_v29  ;;  %v3171_v31 = vpop.f32.mrb[13].mxu0 }
 0x40b   : > { %1054 = vmax.xlane.f32.xlu0 %v1053_v32  ;;  %v1037_v33 = vpop.f32.mrb[14].mxu0 }
 0x40c   : > { %v1044_v34 = vmul.f32 0.17677669, %v1037_v33  ;;  %v3172_v35 = vpop.f32.mrb[15].mxu0  ;;  %v1047_v36 = vadd.f32 %v1043_v30, %v4640_v18 }
 0x40e   : > { %v1056_v37 = vsel %vm1049_vm5, %v1047_v36, -inf  ;;  %v1048_v38 = vadd.f32 %v1044_v34, %v4640_v18 }
 0x40f   : > { %1057 = vmax.xlane.f32.xlu1 %v1056_v37 }
 0x410   : > { %v1059_v39 = vsel %vm1049_vm5, %v1048_v38, -inf }
 0x413   : > { %1060 = vmax.xlane.f32.xlu1 %v1059_v39 }
 0x494   : > { %v1052_v40 = vpop.xlane.xlu0 %1051 }
 0x495   : > { %v1062_v41 = vsub.f32 %v1045_v26, %v1052_v40 }
 0x497   : > { %v1066_v43 = vmul.f32 1.442695, %v1062_v41 }
 0x498   : > { %v1055_v46 = vpop.xlane.xlu0 %1054 }
 0x499   : > { %3559 = vpow2.f32 %v1066_v43  ;;  %v1063_v47 = vsub.f32 %v1046_v28, %v1055_v46 }
 0x49b   : > { %v1068_v48 = vmul.f32 1.442695, %v1063_v47 }
 0x49c   : > { %v1058_v49 = vpop.xlane.xlu1 %1057 }
 0x49d   : > { %3561 = vpow2.f32 %v1068_v48  ;;  %v1064_v50 = vsub.f32 %v1047_v36, %v1058_v49 }
 0x49f   : > { %v1070_v51 = vmul.f32 1.442695, %v1064_v50 }
 0x4a0   : > { %v1061_v52 = vpop.xlane.xlu1 %1060 }
 0x4a1   : > { %3563 = vpow2.f32 %v1070_v51  ;;  %v1065_v53 = vsub.f32 %v1048_v38, %v1061_v52 }
 0x4a3   : > { %v3560_v54 = vpop.eup %3559  ;;  %v1072_v55 = vmul.f32 1.442695, %v1065_v53 }
 0x4a4   : > { %v1074_v56 = vsel %vm1049_vm5, %v3560_v54, 0.0 }
 0x4a5   : > { %3565 = vpow2.f32 %v1072_v55  ;;  %1075 = vadd.xlane.f32.xlu0 %v1074_v56 }
 0x4a7   : > { %v3562_v57 = vpop.eup %3561 }
 0x4a8   : > { %v1077_v60 = vsel %vm1049_vm5, %v3562_v57, 0.0 }
 0x4a9   : > { %1078 = vadd.xlane.f32.xlu1 %v1077_v60 }
 0x4ab   : > { %v3564_v61 = vpop.eup %3563 }
 0x4ac   : > { %v1080_v62 = vsel %vm1049_vm5, %v3564_v61, 0.0 }
 0x4ad   : > { %1081 = vadd.xlane.f32.xlu0 %v1080_v62 }
 0x4af   : > { %v3566_v63 = vpop.eup %3565 }
 0x4b0   : > { %v1083_v0 = vsel %vm1049_vm5, %v3566_v63, 0.0 }
 0x4b1   : > { %1084 = vadd.xlane.f32.xlu1 %v1083_v0 }
 0x4c2   : > { %1253 = vrot.lane.b32.xlu1 %v4614_v6, %s4055_s12 }
 0x4c3   : > { %1200 = vrot.lane.b32.xlu0 %v4607_v59, %s4055_s12 }
 0x4c6   : > { %1197 = vrot.lane.b32.xlu1 %v4605_v58, %s4055_s12 }
 0x4ca   : > { %1250 = vrot.lane.b32.xlu1 %v4612_v5, %s4055_s12 }
 0x532   : > { %v1076_v45 = vpop.xlane.xlu0 %1075 }
 0x533   : > { %3567 = vrcp.f32 %v1076_v45 }
 0x536   : > { %v1079_v15 = vpop.xlane.xlu1 %1078 }
 0x537   : > { %3569 = vrcp.f32 %v1079_v15 }
 0x53a   : > { %v1082_v16 = vpop.xlane.xlu0 %1081 }
 0x53b   : > { %3571 = vrcp.f32 %v1082_v16 }
 0x53d   : > { %v3568_v17 = vpop.eup %3567 }
 0x53e   : > { %v1090_v19 = vmul.f32 %v3568_v17, %v1076_v45  ;;  %v1085_v20 = vpop.xlane.xlu1 %1084  ;;  %v1201_v34 = vpop.permute.xlu0 %1200 }
 0x53f   : > { %3573 = vrcp.f32 %v1085_v20  ;;  %v1206_v38 = vsel %vm946_vm3, %v1201_v34, 0 }
 0x540   : > { %v1094_v22 = vsub.f32 2.0, %v1090_v19 }
 0x541   : > { %v3570_v23 = vpop.eup %3569 }
 0x542   : > { %v1091_v24 = vmul.f32 %v3570_v23, %v1079_v15  ;;  %v1098_v25 = vmul.f32 %v3568_v17, %v1094_v22  ;;  %v1254_v40 = vpop.permute.xlu1 %1253 }
 0x543   : > { %v1259_v49 = vsel %vm946_vm3, %v1254_v40, 0 }
 0x544   : > { %v1095_v26 = vsub.f32 2.0, %v1091_v24  ;;  %v1102_v30 = vmul.f32 %v3560_v54, %v1098_v25 }
 0x545   : > { %v3572_v27 = vpop.eup %3571 }
 0x546   : > { %v1099_v28 = vmul.f32 %v3570_v23, %v1095_v26  ;;  %v1092_v29 = vmul.f32 %v3572_v27, %v1082_v16  ;;  %v1198_v48 = vpop.permute.xlu1 %1197 }
 0x548   : > { %v1103_v31 = vmul.f32 %v3562_v57, %v1099_v28  ;;  %v1096_v32 = vsub.f32 2.0, %v1092_v29 }
 0x549   : > { %v3574_v33 = vpop.eup %3573 }
 0x54a   : > { %v1106_v35 = vpack.c.bf16 %v1103_v31, %v1102_v30  ;;  %v1093_v36 = vmul.f32 %v3574_v33, %v1085_v20  ;;  %v1100_v37 = vmul.f32 %v3572_v27, %v1096_v32  ;;  %v1251_v50 = vpop.permute.xlu1 %1250 }
 0x54c   : > { %v1097_v39 = vsub.f32 2.0, %v1093_v36  ;;  %3176 = vmatmul.mubr.msk.bf16.vlgmr.msra.gmra.mrb[4].mxu1 %vm1049_vm5, %v1106_v35  ;;  %v1104_v43 = vmul.f32 %v3564_v61, %v1100_v37 }
 0x54d   : > { %3186 = vmatpush3.bf16.xpose.msra.mxu1 %v1206_v38  ;;  %3187 = vmatprep.mubr.msk.bf16.mxu1 %vm4053_vm2, %v4052_v42 }
 0x54e   : > { %v1101_v41 = vmul.f32 %v3574_v33, %v1097_v39  ;;  %3197 = vmatprep.subr.bf16.mxu1 %v4052_v42 }
 0x550   : > { %v1105_v46 = vmul.f32 %v3566_v63, %v1101_v41 }
 0x552   : > { %v1107_v47 = vpack.c.bf16 %v1105_v46, %v1104_v43 }
 0x554   : > { %3182 = vmatmul.mubr.msk.bf16.vlgmr.msra.gmra.mrb[16].mxu0 %vm1049_vm5, %v1107_v47  ;;  %3188 = vmatmul.mubr.msk.bf16.vlgmr.msra.gmra.mrb[8].mxu1 %vm946_vm3, %v1198_v48 }
 0x555   : > { %3192 = vmatpush3.bf16.xpose.msra.mxu0 %v1259_v49  ;;  %3193 = vmatprep.mubr.msk.bf16.mxu0 %vm4053_vm2, %v4052_v42 }
 0x556   : > { %3203 = vmatprep.subr.bf16.mxu0 %v4052_v42  ;;  %3199 = vmatprep.mubr.msk.bf16.mxu1 %vm4053_vm2, %v4052_v42 }
 0x55c   : > { %3194 = vmatmul.mubr.msk.bf16.vlgmr.msra.gmra.mrb[20].mxu0 %vm946_vm3, %v1251_v50 }
 0x55d   : > { %3205 = vmatprep.mubr.msk.bf16.mxu0 %vm4053_vm2, %v4052_v42 }
 0x61f   : > { %v4688_v51 = vpop.f32.mrb[4].mxu1 }
 0x620   : > { %v3177_v52 = vpop.f32.mrb[5].mxu1 }
 0x621   : > { %v4690_v53 = vpop.f32.mrb[6].mxu1 }
 0x622   : > { %v3178_v54 = vpop.f32.mrb[7].mxu1 }
 0x627   : > { %v4692_v55 = vpop.f32.mrb[16].mxu0  ;;  %v1242_v56 = vpop.f32.mrb[8].mxu1 }
 0x628   : > { %v1302_v57 = vmul.f32 0.17677669, %v1242_v56  ;;  %v3183_v60 = vpop.f32.mrb[17].mxu0  ;;  %v3189_v61 = vpop.f32.mrb[9].mxu1 }
 0x629   : > { %v4694_v62 = vpop.f32.mrb[18].mxu0  ;;  %v1245_v63 = vpop.f32.mrb[10].mxu1 }
 0x62a   : > { %v1303_v0 = vmul.f32 0.17677669, %v1245_v63  ;;  %v3184_v1 = vpop.f32.mrb[19].mxu0  ;;  %v3190_v2 = vpop.f32.mrb[11].mxu1  ;;  %v1306_v3 = vadd.f32 %v1302_v57, %v4640_v18 }
 0x62c   : > { %v1310_v4 = vsel %vm1049_vm5, %v1306_v3, -inf  ;;  %v1307_v7 = vadd.f32 %v1303_v0, %v4640_v18 }
 0x62d   : > { %1311 = vmax.xlane.f32.xlu0 %v1310_v4 }
 0x62e   : > { %v1313_v8 = vsel %vm1049_vm5, %v1307_v7, -inf }
 0x62f   : > { %1314 = vmax.xlane.f32.xlu1 %v1313_v8  ;;  %v1295_v9 = vpop.f32.mrb[20].mxu0 }
 0x630   : > { %v1304_v10 = vmul.f32 0.17677669, %v1295_v9  ;;  %v3195_v11 = vpop.f32.mrb[21].mxu0 }
 0x631   : > { %v1298_v12 = vpop.f32.mrb[22].mxu0 }
 0x632   : > { %v1305_v45 = vmul.f32 0.17677669, %v1298_v12  ;;  %v3196_v15 = vpop.f32.mrb[23].mxu0  ;;  %v1308_v16 = vadd.f32 %v1304_v10, %v4640_v18 }
 0x634   : > { %v1316_v17 = vsel %vm1049_vm5, %v1308_v16, -inf  ;;  %v1309_v19 = vadd.f32 %v1305_v45, %v4640_v18 }
 0x635   : > { %1317 = vmax.xlane.f32.xlu0 %v1316_v17 }
 0x636   : > { %v1319_v20 = vsel %vm1049_vm5, %v1309_v19, -inf }
 0x639   : > { %1320 = vmax.xlane.f32.xlu0 %v1319_v20 }
 0x6ba   : > { %v1312_v22 = vpop.xlane.xlu0 %1311 }
 0x6bb   : > { %v1322_v23 = vsub.f32 %v1306_v3, %v1312_v22 }
 0x6bc   : > { %v1315_v24 = vpop.xlane.xlu1 %1314 }
 0x6bd   : > { %v1326_v25 = vmul.f32 1.442695, %v1322_v23  ;;  %v1323_v26 = vsub.f32 %v1307_v7, %v1315_v24 }
 0x6bf   : > { %3575 = vpow2.f32 %v1326_v25  ;;  %v1328_v27 = vmul.f32 1.442695, %v1323_v26 }
 0x6c1   : > { %3577 = vpow2.f32 %v1328_v27 }
 0x6c2   : > { %v1318_v28 = vpop.xlane.xlu0 %1317 }
 0x6c3   : > { %v1324_v29 = vsub.f32 %v1308_v16, %v1318_v28 }
 0x6c5   : > { %v1330_v30 = vmul.f32 1.442695, %v1324_v29 }
 0x6c6   : > { %v1321_v37 = vpop.xlane.xlu0 %1320 }
 0x6c7   : > { %3579 = vpow2.f32 %v1330_v30  ;;  %v1325_v38 = vsub.f32 %v1309_v19, %v1321_v37 }
 0x6c9   : > { %v3576_v31 = vpop.eup %3575  ;;  %v1332_v39 = vmul.f32 1.442695, %v1325_v38 }
 0x6ca   : > { %v1334_v32 = vsel %vm1049_vm5, %v3576_v31, 0.0 }
 0x6cb   : > { %v3578_v33 = vpop.eup %3577  ;;  %1335 = vadd.xlane.f32.xlu0 %v1334_v32  ;;  %3581 = vpow2.f32 %v1332_v39 }
 0x6cc   : > { %v1337_v34 = vsel %vm1049_vm5, %v3578_v33, 0.0 }
 0x6cd   : > { %1338 = vadd.xlane.f32.xlu1 %v1337_v34 }
 0x6d1   : > { %v3580_v35 = vpop.eup %3579 }
 0x6d2   : > { %v1340_v36 = vsel %vm1049_vm5, %v3580_v35, 0.0 }
 0x6d3   : > { %1341 = vadd.xlane.f32.xlu0 %v1340_v36 }
 0x6d5   : > { %v3582_v40 = vpop.eup %3581 }
 0x6d6   : > { %v1343_v41 = vsel %vm1049_vm5, %v3582_v40, 0.0 }
 0x6de   : > { %1417 = vrot.lane.b32.xlu1 %v4656_v13, %s4055_s12 }
 0x6e2   : > { %1466 = vrot.lane.b32.xlu1 %v4607_v59, %s4056_s7 }
 0x6e9   : > { %1369 = vrot.lane.b32.xlu0 %v4658_v14, %s4055_s12 }
 0x6ed   : > { %1464 = vrot.lane.b32.xlu0 %v4605_v58, %s4056_s7 }
 0x706   : > { %1344 = vadd.xlane.f32.xlu1 %v1343_v41 }
 0x717   : > { %1517 = vrot.lane.b32.xlu1 %v4614_v6, %s4056_s7 }
 0x71b   : > { %1515 = vrot.lane.b32.xlu1 %v4612_v5, %s4056_s7 }
 0x758   : > { %v1336_v43 = vpop.xlane.xlu0 %1335 }
 0x759   : > { %3583 = vrcp.f32 %v1336_v43 }
 0x75a   : > { %v1339_v46 = vpop.xlane.xlu1 %1338 }
 0x75b   : > { %3585 = vrcp.f32 %v1339_v46 }
 0x75e   : > { %v1418_v47 = vpop.permute.xlu1 %1417 }
 0x75f   : > { %3204 = vmatpush3.bf16.msra.mxu0 %v1418_v47 }
 0x760   : > { %v1342_v48 = vpop.xlane.xlu0 %1341  ;;  %3215 = vmatprep.subr.bf16.mxu0 %v4052_v42 }
 0x761   : > { %3587 = vrcp.f32 %v1342_v48 }
 0x762   : > { %v1467_v2 = vpop.permute.xlu1 %1466 }
 0x763   : > { %v3584_v49 = vpop.eup %3583  ;;  %v1472_v4 = vsel %vm946_vm3, %v1467_v2, 0 }
 0x764   : > { %v1350_v50 = vmul.f32 %v3584_v49, %v1336_v43  ;;  %v1370_v52 = vpop.permute.xlu0 %1369 }
 0x765   : > { %v3586_v54 = vpop.eup %3585  ;;  %3198 = vmatpush3.bf16.msra.mxu1 %v1370_v52 }
 0x766   : > { %v1354_v56 = vsub.f32 2.0, %v1350_v50  ;;  %v1351_v57 = vmul.f32 %v3586_v54, %v1339_v46  ;;  %3209 = vmatprep.subr.bf16.mxu1 %v4052_v42 }
 0x768   : > { %v1358_v60 = vmul.f32 %v3584_v49, %v1354_v56  ;;  %v1355_v61 = vsub.f32 2.0, %v1351_v57  ;;  %v1465_v7 = vpop.permute.xlu0 %1464 }
 0x76a   : > { %v1359_v63 = vmul.f32 %v3586_v54, %v1355_v61  ;;  %v1362_v0 = vmul.f32 %v3576_v31, %v1358_v60 }
 0x76b   : > { %v3588_v9 = vpop.eup %3587 }
 0x76c   : > { %v1363_v1 = vmul.f32 %v3578_v33, %v1359_v63  ;;  %v1352_v10 = vmul.f32 %v3588_v9, %v1342_v48 }
 0x76e   : > { %v1366_v3 = vpack.c.bf16 %v1363_v1, %v1362_v0  ;;  %v1356_v11 = vsub.f32 2.0, %v1352_v10 }
 0x770   : > { %3200 = vmatmul.mubr.msk.bf16.vlgmr.msra.gmra.mrb[12].mxu1 %vm1049_vm5, %v1366_v3  ;;  %v1360_v15 = vmul.f32 %v3588_v9, %v1356_v11 }
 0x771   : > { %3210 = vmatpush3.bf16.xpose.msra.mxu1 %v1472_v4  ;;  %3211 = vmatprep.mubr.msk.bf16.mxu1 %vm4053_vm2, %v4052_v42 }
 0x772   : > { %3221 = vmatprep.subr.bf16.mxu1 %v4052_v42  ;;  %v1364_v19 = vmul.f32 %v3580_v35, %v1360_v15 }
 0x778   : > { %3212 = vmatmul.mubr.msk.bf16.vlgmr.msra.gmra.mrb[16].mxu1 %vm946_vm3, %v1465_v7 }
 0x779   : > { %3223 = vmatprep.mubr.msk.bf16.mxu1 %vm4053_vm2, %v4052_v42 }
 0x793   : > { %v1345_v8 = vpop.xlane.xlu1 %1344 }
 0x794   : > { %3589 = vrcp.f32 %v1345_v8 }
 0x797   : > { %v1518_v22 = vpop.permute.xlu1 %1517 }
 0x798   : > { %v1523_v24 = vsel %vm946_vm3, %v1518_v22, 0 }
 0x79b   : > { %v1516_v25 = vpop.permute.xlu1 %1515 }
 0x79e   : > { %v3590_v12 = vpop.eup %3589 }
 0x79f   : > { %v1353_v45 = vmul.f32 %v3590_v12, %v1345_v8 }
 0x7a1   : > { %v1357_v16 = vsub.f32 2.0, %v1353_v45 }
 0x7a3   : > { %v1361_v17 = vmul.f32 %v3590_v12, %v1357_v16 }
 0x7a5   : > { %v1365_v20 = vmul.f32 %v3582_v40, %v1361_v17 }
 0x7a7   : > { %v1367_v23 = vpack.c.bf16 %v1365_v20, %v1364_v19 }
 0x7a9   : > { %3206 = vmatmul.mubr.msk.bf16.vlgmr.msra.gmra.mrb[24].mxu0 %vm1049_vm5, %v1367_v23 }
 0x7aa   : > { %3216 = vmatpush3.bf16.xpose.msra.mxu0 %v1523_v24  ;;  %3217 = vmatprep.mubr.msk.bf16.mxu0 %vm4053_vm2, %v4052_v42 }
 0x7ab   : > { %3227 = vmatprep.subr.bf16.mxu0 %v4052_v42 }
 0x7b1   : > { %3218 = vmatmul.mubr.msk.bf16.vlgmr.msra.gmra.mrb[28].mxu0 %vm946_vm3, %v1516_v25 }
 0x7b2   : > { %3229 = vmatprep.mubr.msk.bf16.mxu0 %vm4053_vm2, %v4052_v42 }
 0x843   : > { %v4738_v26 = vpop.f32.mrb[12].mxu1 }
 0x844   : > { %v3201_v27 = vpop.f32.mrb[13].mxu1 }
 0x845   : > { %v4740_v28 = vpop.f32.mrb[14].mxu1 }
 0x846   : > { %v3449_v29 = vpack.i.bf16 %v4740_v28, %v4738_v26  ;;  %v3202_v30 = vpop.f32.mrb[15].mxu1 }
 0x84b   : > { %v1508_v31 = vpop.f32.mrb[16].mxu1 }
 0x84c   : > { %v1566_v32 = vmul.f32 0.17677669, %v1508_v31  ;;  %v3213_v33 = vpop.f32.mrb[17].mxu1 }
 0x84d   : > { %v1511_v34 = vpop.f32.mrb[18].mxu1 }
 0x84e   : > { %v1567_v35 = vmul.f32 0.17677669, %v1511_v34  ;;  %v3214_v36 = vpop.f32.mrb[19].mxu1  ;;  %v1570_v37 = vadd.f32 %v1566_v32, %v4640_v18 }
 0x850   : > { %v1574_v38 = vsel %vm1049_vm5, %v1570_v37, -inf  ;;  %v1571_v39 = vadd.f32 %v1567_v35, %v4640_v18 }
 0x851   : > { %1575 = vmax.xlane.f32.xlu0 %v1574_v38 }
 0x852   : > { %v1577_v40 = vsel %vm1049_vm5, %v1571_v39, -inf }
 0x853   : > { %1578 = vmax.xlane.f32.xlu1 %v1577_v40 }
 0x87c   : > { %v4748_v41 = vpop.f32.mrb[24].mxu0 }
 0x87d   : > { %v3207_v43 = vpop.f32.mrb[25].mxu0 }
 0x87e   : > { %v4750_v46 = vpop.f32.mrb[26].mxu0 }
 0x87f   : > { %v3454_v47 = vpack.i.bf16 %v4750_v46, %v4748_v41  ;;  %v3208_v48 = vpop.f32.mrb[27].mxu0 }
 0x884   : > { %v1559_v49 = vpop.f32.mrb[28].mxu0 }
 0x885   : > { %v1568_v50 = vmul.f32 0.17677669, %v1559_v49  ;;  %v3219_v52 = vpop.f32.mrb[29].mxu0 }
 0x886   : > { %v1562_v54 = vpop.f32.mrb[30].mxu0 }
 0x887   : > { %v1569_v56 = vmul.f32 0.17677669, %v1562_v54  ;;  %v3220_v57 = vpop.f32.mrb[31].mxu0  ;;  %v1572_v60 = vadd.f32 %v1568_v50, %v4640_v18 }
 0x889   : > { %v1580_v61 = vsel %vm1049_vm5, %v1572_v60, -inf  ;;  %v1573_v63 = vadd.f32 %v1569_v56, %v4640_v18 }
 0x88a   : > { %1581 = vmax.xlane.f32.xlu0 %v1580_v61 }
 0x88b   : > { %v1583_v0 = vsel %vm1049_vm5, %v1573_v63, -inf }
 0x88e   : > { %1584 = vmax.xlane.f32.xlu0 %v1583_v0 }
 0x8de   : > { %v1576_v1 = vpop.xlane.xlu0 %1575 }
 0x8df   : > { %v1586_v2 = vsub.f32 %v1570_v37, %v1576_v1 }
 0x8e0   : > { %v1579_v3 = vpop.xlane.xlu1 %1578 }
 0x8e1   : > { %v1590_v4 = vmul.f32 1.442695, %v1586_v2  ;;  %v1587_v7 = vsub.f32 %v1571_v39, %v1579_v3 }
 0x8e3   : > { %3591 = vpow2.f32 %v1590_v4  ;;  %v1592_v8 = vmul.f32 1.442695, %v1587_v7 }
 0x8e5   : > { %3593 = vpow2.f32 %v1592_v8 }
 0x8ed   : > { %v3592_v9 = vpop.eup %3591 }
 0x8ee   : > { %v1598_v10 = vsel %vm1049_vm5, %v3592_v9, 0.0 }
 0x8ef   : > { %v3594_v11 = vpop.eup %3593  ;;  %1599 = vadd.xlane.f32.xlu0 %v1598_v10 }
 0x8f0   : > { %v1601_v12 = vsel %vm1049_vm5, %v3594_v11, 0.0 }
 0x8f1   : > { %1602 = vadd.xlane.f32.xlu1 %v1601_v12 }
 0x902   : > { %1679 = vrot.lane.b32.xlu1 %v4656_v13, %s4056_s7 }
 0x906   : > { %1728 = vrot.lane.b32.xlu1 %v4607_v59, %s4057_s6 }
 0x917   : > { %v1582_v45 = vpop.xlane.xlu0 %1581 }
 0x918   : > { %v1588_v15 = vsub.f32 %v1572_v60, %v1582_v45 }
 0x91a   : > { %v1594_v16 = vmul.f32 1.442695, %v1588_v15 }
 0x91b   : > { %v1585_v17 = vpop.xlane.xlu0 %1584 }
 0x91c   : > { %3595 = vpow2.f32 %v1594_v16  ;;  %v1589_v19 = vsub.f32 %v1573_v63, %v1585_v17 }
 0x91e   : > { %v1596_v20 = vmul.f32 1.442695, %v1589_v19 }
 0x920   : > { %3597 = vpow2.f32 %v1596_v20 }
 0x926   : > { %v3596_v22 = vpop.eup %3595 }
 0x927   : > { %v1604_v23 = vsel %vm1049_vm5, %v3596_v22, 0.0 }
 0x928   : > { %1605 = vadd.xlane.f32.xlu0 %v1604_v23 }
 0x92a   : > { %v3598_v24 = vpop.eup %3597 }
 0x92b   : > { %v1607_v25 = vsel %vm1049_vm5, %v3598_v24, 0.0 }
 0x92c   : > { %1608 = vadd.xlane.f32.xlu1 %v1607_v25 }
 0x93d   : > { %1779 = vrot.lane.b32.xlu1 %v4614_v6, %s4057_s6 }
 0x93e   : > { %1632 = vrot.lane.b32.xlu0 %v4658_v14, %s4056_s7 }
 0x941   : > { %1777 = vrot.lane.b32.xlu1 %v4612_v5, %s4057_s6 }
 0x942   : > { %1726 = vrot.lane.b32.xlu0 %v4605_v58, %s4057_s6 }
 0x97c   : > { %v1600_v30 = vpop.xlane.xlu0 %1599 }
 0x97e   : > { %v1603_v59 = vpop.xlane.xlu1 %1602 }
 0x97f   : > { %3599 = vrcp.f32 %v1603_v59 }
 0x980   : > { %3601 = vrcp.f32 %v1600_v30 }
 0x982   : > { %v1680_v27 = vpop.permute.xlu1 %1679 }
 0x983   : > { %3228 = vmatpush3.bf16.msra.mxu0 %v1680_v27 }
 0x984   : > { %3239 = vmatprep.subr.bf16.mxu0 %v4052_v42 }
 0x986   : > { %v1729_v5 = vpop.permute.xlu1 %1728 }
 0x987   : > { %v1734_v52 = vsel %vm946_vm3, %v1729_v5, 0 }
 0x989   : > { %v3600_v31 = vpop.eup %3599 }
 0x98a   : > { %v3602_v32 = vpop.eup %3601  ;;  %v1615_v6 = vmul.f32 %v3600_v31, %v1603_v59 }
 0x98b   : > { %v1614_v33 = vmul.f32 %v3602_v32, %v1600_v30 }
 0x98c   : > { %v1619_v34 = vsub.f32 2.0, %v1615_v6 }
 0x98d   : > { %v1618_v35 = vsub.f32 2.0, %v1614_v33 }
 0x98e   : > { %v1623_v36 = vmul.f32 %v3600_v31, %v1619_v34 }
 0x98f   : > { %v1622_v37 = vmul.f32 %v3602_v32, %v1618_v35 }
 0x990   : > { %v1627_v58 = vmul.f32 %v3594_v11, %v1623_v36 }
 0x991   : > { %v1626_v39 = vmul.f32 %v3592_v9, %v1622_v37 }
 0x993   : > { %v1630_v48 = vpack.c.bf16 %v1627_v58, %v1626_v39 }
 0x9b5   : > { %v1606_v38 = vpop.xlane.xlu0 %1605 }
 0x9b6   : > { %3603 = vrcp.f32 %v1606_v38 }
 0x9b9   : > { %v1609_v40 = vpop.xlane.xlu1 %1608  ;;  %v1633_v43 = vpop.permute.xlu0 %1632 }
 0x9ba   : > { %3605 = vrcp.f32 %v1609_v40  ;;  %3222 = vmatpush3.bf16.msra.mxu1 %v1633_v43 }
 0x9bb   : > { %3233 = vmatprep.subr.bf16.mxu1 %v4052_v42 }
 0x9bd   : > { %3224 = vmatmul.mubr.msk.bf16.vlgmr.msra.gmra.mrb[20].mxu1 %vm1049_vm5, %v1630_v48  ;;  %v1727_v0 = vpop.permute.xlu0 %1726  ;;  %v1780_v3 = vpop.permute.xlu1 %1779 }
 0x9be   : > { %3235 = vmatprep.mubr.msk.bf16.mxu1 %vm4053_vm2, %v4052_v42  ;;  %v1785_v7 = vsel %vm946_vm3, %v1780_v3, 0 }
 0x9c0   : > { %v3604_v49 = vpop.eup %3603 }
 0x9c1   : > { %v1616_v50 = vmul.f32 %v3604_v49, %v1606_v38  ;;  %v1778_v8 = vpop.permute.xlu1 %1777 }
 0x9c3   : > { %v1620_v54 = vsub.f32 2.0, %v1616_v50  ;;  %3234 = vmatpush3.bf16.xpose.msra.mxu1 %v1734_v52 }
 0x9c4   : > { %v3606_v56 = vpop.eup %3605  ;;  %3245 = vmatprep.subr.bf16.mxu1 %v4052_v42 }
 0x9c5   : > { %v1617_v57 = vmul.f32 %v3606_v56, %v1609_v40  ;;  %v1624_v60 = vmul.f32 %v3604_v49, %v1620_v54 }
 0x9c7   : > { %v1621_v61 = vsub.f32 2.0, %v1617_v57  ;;  %v1628_v1 = vmul.f32 %v3596_v22, %v1624_v60 }
 0x9c9   : > { %v1625_v63 = vmul.f32 %v3606_v56, %v1621_v61 }
 0x9ca   : > { %3236 = vmatmul.mubr.msk.bf16.vlgmr.msra.gmra.mrb[24].mxu1 %vm946_vm3, %v1727_v0 }
 0x9cb   : > { %v1629_v2 = vmul.f32 %v3598_v24, %v1625_v63  ;;  %3247 = vmatprep.mubr.msk.bf16.mxu1 %vm4053_vm2, %v4052_v42 }
 0x9cd   : > { %v1631_v4 = vpack.c.bf16 %v1629_v2, %v1628_v1 }
 0x9cf   : > { %3230 = vmatmul.mubr.msk.bf16.vlgmr.msra.gmra.mrb[32].mxu0 %vm1049_vm5, %v1631_v4 }
 0x9d0   : > { %3240 = vmatpush3.bf16.xpose.msra.mxu0 %v1785_v7  ;;  %3241 = vmatprep.mubr.msk.bf16.mxu0 %vm4053_vm2, %v4052_v42 }
 0x9d1   : > { %3251 = vmatprep.subr.bf16.mxu0 %v4052_v42 }
 0x9d7   : > { %3242 = vmatmul.mubr.msk.bf16.vlgmr.msra.gmra.mrb[36].mxu0 %vm946_vm3, %v1778_v8 }
 0x9d8   : > { %3253 = vmatprep.mubr.msk.bf16.mxu0 %vm4053_vm2, %v4052_v42 }
 0xa90   : > { %v4792_v9 = vpop.f32.mrb[20].mxu1 }
 0xa91   : > { %v3225_v10 = vpop.f32.mrb[21].mxu1 }
 0xa92   : > { %v4794_v11 = vpop.f32.mrb[22].mxu1 }
 0xa93   : > { %v3459_v12 = vpack.i.bf16 %v4794_v11, %v4792_v9  ;;  %v3226_v45 = vpop.f32.mrb[23].mxu1 }
 0xa9d   : > { %v1770_v15 = vpop.f32.mrb[24].mxu1 }
 0xa9e   : > { %v1828_v16 = vmul.f32 0.17677669, %v1770_v15  ;;  %v3237_v17 = vpop.f32.mrb[25].mxu1 }
 0xa9f   : > { %v1773_v19 = vpop.f32.mrb[26].mxu1 }
 0xaa0   : > { %v1829_v20 = vmul.f32 0.17677669, %v1773_v19  ;;  %v3238_v22 = vpop.f32.mrb[27].mxu1  ;;  %v1832_v23 = vadd.f32 %v1828_v16, %v4640_v18 }
 0xaa2   : > { %v1719_v24 = vpop.f32.mrb[32].mxu0  ;;  %v1836_v42 = vsel %vm1049_vm5, %v1832_v23, -inf  ;;  %v1833_v25 = vadd.f32 %v1829_v20, %v4640_v18 }
 0xaa3   : > { %1837 = vmax.xlane.f32.xlu0 %v1836_v42  ;;  %v3231_v59 = vpop.f32.mrb[33].mxu0 }
 0xaa4   : > { %v1722_v27 = vpop.f32.mrb[34].mxu0  ;;  %v1839_v30 = vsel %vm1049_vm5, %v1833_v25, -inf }
 0xaa5   : > { %v3464_v31 = vpack.i.bf16 %v1722_v27, %v1719_v24  ;;  %1840 = vmax.xlane.f32.xlu1 %v1839_v30  ;;  %v3232_v32 = vpop.f32.mrb[35].mxu0 }
 0xaaa   : > { %v1821_v6 = vpop.f32.mrb[36].mxu0 }
 0xaab   : > { %v1830_v33 = vmul.f32 0.17677669, %v1821_v6  ;;  %v3243_v34 = vpop.f32.mrb[37].mxu0  ;;  %v3511_v6 = vld [vmem:[%s4548_s17] sm:$0xff]  }
 0xaac   : > { %v1824_v35 = vpop.f32.mrb[38].mxu0  ;;  %v3513_v34 = vld [vmem:[%s4548_s17 + $0x10] sm:$0xff]  }
 0xaad   : > { %v1831_v36 = vmul.f32 0.17677669, %v1824_v35  ;;  %v3244_v37 = vpop.f32.mrb[39].mxu0  ;;  %v1834_v5 = vadd.f32 %v1830_v33, %v4640_v18  ;;  %v3512_v33 = vld [vmem:[%s4548_s17 + $0x8] sm:$0xff]   ;;  %v3514_v35 = vld [vmem:[%s4548_s17 + $0x18] sm:$0xff]  }
 0xaae   : > { %v3516_v37 = vld [vmem:[%s4548_s17 + $0x28] sm:$0xff]  }
 0xaaf   : > { %v1842_v38 = vsel %vm1049_vm5, %v1834_v5, -inf  ;;  %v1835_v58 = vadd.f32 %v1831_v36, %v4640_v18  ;;  %v3515_v36 = vld [vmem:[%s4548_s17 + $0x20] sm:$0xff]  }
 0xab0   : > { %1843 = vmax.xlane.f32.xlu0 %v1842_v38 }
 0xab1   : > { %v1845_v39 = vsel %vm1049_vm5, %v1835_v58, -inf }
 0xab4   : > { %1846 = vmax.xlane.f32.xlu0 %v1845_v39 }
 0xb30   : > { %v1838_v40 = vpop.xlane.xlu0 %1837 }
 0xb31   : > { %v1848_v43 = vsub.f32 %v1832_v23, %v1838_v40 }
 0xb32   : > { %v1841_v48 = vpop.xlane.xlu1 %1840 }
 0xb33   : > { %v1852_v49 = vmul.f32 1.442695, %v1848_v43  ;;  %v1849_v50 = vsub.f32 %v1833_v25, %v1841_v48  ;;  %v3518_v48 = vld [vmem:[%s4548_s17 + $0x38] sm:$0xff]  }
 0xb35   : > { %3607 = vpow2.f32 %v1852_v49  ;;  %v1854_v52 = vmul.f32 1.442695, %v1849_v50 }
 0xb37   : > { %3609 = vpow2.f32 %v1854_v52 }
 0xb3d   : > { %v1844_v54 = vpop.xlane.xlu0 %1843 }
 0xb3e   : > { %v1850_v56 = vsub.f32 %v1834_v5, %v1844_v54  ;;  %v3517_v5 = vld [vmem:[%s4548_s17 + $0x30] sm:$0xff]  }
 0xb3f   : > { %v3608_v57 = vpop.eup %3607 }
 0xb40   : > { %v1856_v60 = vmul.f32 1.442695, %v1850_v56  ;;  %v1860_v61 = vsel %vm1049_vm5, %v3608_v57, 0.0 }
 0xb41   : > { %v3610_v63 = vpop.eup %3609  ;;  %1861 = vadd.xlane.f32.xlu0 %v1860_v61  ;;  %v1847_v18 = vpop.xlane.xlu0 %1846 }
 0xb42   : > { %3611 = vpow2.f32 %v1856_v60  ;;  %v1851_v0 = vsub.f32 %v1835_v58, %v1847_v18  ;;  %v1863_v1 = vsel %vm1049_vm5, %v3610_v63, 0.0 }
 0xb43   : > { %1864 = vadd.xlane.f32.xlu1 %v1863_v1 }
 0xb44   : > { %v1858_v2 = vmul.f32 1.442695, %v1851_v0 }
 0xb46   : > { %3613 = vpow2.f32 %v1858_v2 }
 0xb4c   : > { %v3612_v3 = vpop.eup %3611 }
 0xb4d   : > { %v1866_v4 = vsel %vm1049_vm5, %v3612_v3, 0.0 }
 0xb4e   : > { %1867 = vadd.xlane.f32.xlu0 %v1866_v4 }
 0xb50   : > { %v3614_v7 = vpop.eup %3613 }
 0xb51   : > { %v1869_v8 = vsel %vm1049_vm5, %v3614_v7, 0.0 }
 0xb52   : > { %1870 = vadd.xlane.f32.xlu1 %v1869_v8 }
 0xb63   : > { %1941 = vrot.lane.b32.xlu1 %v4656_v13, %s4057_s6 }
 0xb64   : > { %1894 = vrot.lane.b32.xlu0 %v4658_v14, %s4057_s6 }
 0xb67   : > { %3450 = vrot.lane.b32.xlu1 %v3449_v29, %s4057_s6 }
 0xb68   : > { %3460 = vrot.lane.b32.xlu0 %v3459_v12, %s4056_s7 }
 0xb6b   : > { %3455 = vrot.lane.b32.xlu1 %v3454_v47, %s4057_s6 }
 0xb6f   : > { %3465 = vrot.lane.b32.xlu1 %v3464_v31, %s4056_s7 }
 0xbce   : > { %v1862_v9 = vpop.xlane.xlu0 %1861 }
 0xbcf   : > { %3615 = vrcp.f32 %v1862_v9 }
 0xbd0   : > { %v1865_v13 = vpop.xlane.xlu1 %1864 }
 0xbd1   : > { %3617 = vrcp.f32 %v1865_v13 }
 0xbd9   : > { %v3616_v10 = vpop.eup %3615 }
 0xbda   : > { %v1876_v14 = vmul.f32 %v3616_v10, %v1862_v9 }
 0xbdb   : > { %v3618_v11 = vpop.eup %3617  ;;  %v1868_v45 = vpop.xlane.xlu0 %1867 }
 0xbdc   : > { %v1880_v15 = vsub.f32 2.0, %v1876_v14  ;;  %v1877_v26 = vmul.f32 %v3618_v11, %v1865_v13  ;;  %3619 = vrcp.f32 %v1868_v45 }
 0xbde   : > { %v1884_v28 = vmul.f32 %v3616_v10, %v1880_v15  ;;  %v1881_v29 = vsub.f32 2.0, %v1877_v26 }
 0xbdf   : > { %v1871_v12 = vpop.xlane.xlu1 %1870  ;;  %v1895_v16 = vpop.permute.xlu0 %1894 }
 0xbe0   : > { %v1885_v17 = vmul.f32 %v3618_v11, %v1881_v29  ;;  %3621 = vrcp.f32 %v1871_v12  ;;  %3246 = vmatpush3.bf16.msra.mxu1 %v1895_v16  ;;  %v1888_v41 = vmul.f32 %v3608_v57, %v1884_v28 }
 0xbe1   : > { %3257 = vmatprep.subr.bf16.mxu1 %v3511_v6 }
 0xbe2   : > { %v1889_v46 = vmul.f32 %v3610_v63, %v1885_v17 }
 0xbe3   : > { %v1942_v47 = vpop.permute.xlu1 %1941  ;;  %v3461_v63 = vpop.permute.xlu0 %3460 }
 0xbe4   : > { %v1892_v19 = vpack.c.bf16 %v1889_v46, %v1888_v41  ;;  %3252 = vmatpush3.bf16.msra.mxu0 %v1942_v47  ;;  %v3463_v1 = vunpack.i.h.bf16 %v3461_v63  ;;  %v3462_v2 = vunpack.i.l.bf16 %v3461_v63 }
 0xbe6   : > { %v3620_v20 = vpop.eup %3619  ;;  %3248 = vmatmul.mubr.msk.bf16.vlgmr.msra.gmra.mrb[28].mxu1 %vm1049_vm5, %v1892_v19 }
 0xbe7   : > { %v1878_v22 = vmul.f32 %v3620_v20, %v1868_v45  ;;  %3258 = vmatpush3.bf16.msra.mxu1 %v3511_v6  ;;  %v3451_v57 = vpop.permute.xlu1 %3450  ;;  %v3657_v6 = vld [vmem:[#allocation2 + $0x8] sm:$0xff] }
 0xbe8   : > { %3259 = vmatprep.subr.bf16.mxu1 %v3512_v33  ;;  %v3453_v60 = vunpack.i.h.bf16 %v3451_v57  ;;  %v3452_v61 = vunpack.i.l.bf16 %v3451_v57 }
 0xbe9   : > { %v1882_v23 = vsub.f32 2.0, %v1878_v22  ;;  %v2070_v22 = vsub.s32 1, %v4596_v44 }
 0xbea   : > { %v3622_v24 = vpop.eup %3621  ;;  %v2037_v18 = vsel %vm946_vm3, %v4690_v53, %v3453_v60  ;;  %v2036_v0 = vsel %vm946_vm3, %v4688_v51, %v3452_v61 }
 0xbeb   : > { %v1879_v42 = vmul.f32 %v3622_v24, %v1871_v12  ;;  %v1886_v25 = vmul.f32 %v3620_v20, %v1882_v23  ;;  %3260 = vmatpush3.bf16.msra.mxu1 %v3512_v33  ;;  %v2041_v8 = vsel %vm2040_vm6, %v2036_v0, %v3462_v2  ;;  %v2042_v9 = vsel %vm2040_vm6, %v2037_v18, %v3463_v1  ;;  %v3456_v14 = vpop.permute.xlu1 %3455  ;;  %v4855_v23 = vld [vmem:[%s4558_s26] sm:$0xff] }
 0xbec   : > { %3261 = vmatprep.subr.bf16.mxu1 %v3513_v34  ;;  %v3458_v51 = vunpack.i.h.bf16 %v3456_v14  ;;  %v3457_v45 = vunpack.i.l.bf16 %v3456_v14  ;;  %v3536_v14 = vld [vmem:[%s4550_s18 + $0x54] ss:$8 sps:$4 sm:$0xff]  }
 0xbed   : > { %v1883_v59 = vsub.f32 2.0, %v1879_v42  ;;  %v1890_v30 = vmul.f32 %v3612_v3, %v1886_v25 }
 0xbee   : > { %v2039_v29 = vsel %vm946_vm3, %v4694_v62, %v3458_v51  ;;  %v2038_v12 = vsel %vm946_vm3, %v4692_v55, %v3457_v45  ;;  %v2071_v62 = vrot.slane %v4855_v23, %v2070_v22  ;;  %v3537_v51 = vld [vmem:[%s4550_s18 + $0x60] ss:$8 sps:$4 sm:$0xff]   ;;  %v3542_v45 = vld [vmem:[%s4550_s18 + $0x74] ss:$8 sps:$4 sm:$0xff]  }
 0xbef   : > { %v1887_v27 = vmul.f32 %v3622_v24, %v1883_v59  ;;  %3262 = vmatpush3.bf16.msra.mxu1 %v3513_v34  ;;  %v3466_v11 = vpop.permute.xlu1 %3465 }
 0xbf0   : > { %3263 = vmatprep.subr.bf16.mxu1 %v3514_v35  ;;  %v3468_v15 = vunpack.i.h.bf16 %v3466_v11  ;;  %v3467_v26 = vunpack.i.l.bf16 %v3466_v11  ;;  %v3539_v11 = vld [vmem:[%s4550_s18 + $0x64] ss:$8 sps:$4 sm:$0xff]  }
 0xbf1   : > { %v1891_v31 = vmul.f32 %v3614_v7, %v1887_v27 }
 0xbf2   : > { %v2043_v41 = vsel %vm2040_vm6, %v2038_v12, %v3467_v26  ;;  %v2044_v46 = vsel %vm2040_vm6, %v2039_v29, %v3468_v15  ;;  %v3540_v15 = vld [vmem:[%s4550_s18 + $0x70] ss:$8 sps:$4 sm:$0xff]   ;;  %v3543_v26 = vld [vmem:[%s4556_s24 + $0x40] sm:$0xff]   ;;  %v3545_v29 = vld [vmem:[%s4556_s24 + $0x48] sm:$0xff]  }
 0xbf3   : > { %v1893_v32 = vpack.c.bf16 %v1891_v31, %v1890_v30  ;;  %3264 = vmatpush3.bf16.msra.mxu1 %v3514_v35  ;;  %v3656_v31 = vld [vmem:[#allocation2] sm:$0xff]  ;;  %v3658_v35 = vld [vmem:[#allocation2 + $0x10] sm:$0xff] }
 0xbf4   : > { %3265 = vmatprep.subr.bf16.mxu1 %v3515_v36  ;;  %v3546_v12 = vld [vmem:[%s4556_s24 + $0x8] sm:$0xff]  }
 0xbf5   : > { %3254 = vmatmul.mubr.msk.bf16.vlgmr.msra.gmra.mrb[40].mxu0 %vm1049_vm5, %v1893_v32 }
 0xbf6   : > { %2372 = vmatprep.mubr.bf16.mxu0 %v4051_v21 }
 0xbf7   : > { %3266 = vmatpush3.bf16.msra.mxu1 %v3515_v36 }
 0xbf8   : > { %3267 = vmatprep.subr.bf16.mxu1 %v3516_v37 }
 0xbfb   : > { %3268 = vmatpush3.bf16.msra.mxu1 %v3516_v37  ;;  %v3659_v37 = vld [vmem:[#allocation2 + $0x18] sm:$0xff] }
 0xbfc   : > { %3269 = vmatprep.subr.bf16.mxu1 %v3517_v5 }
 0xbff   : > { %3270 = vmatpush3.bf16.msra.mxu1 %v3517_v5 }
 0xc00   : > { %3271 = vmatprep.subr.bf16.mxu1 %v3518_v48 }
 0xc03   : > { %3272 = vmatpush3.bf16.msra.mxu1 %v3518_v48 }
 0xc04   : > { %3105 = vmatprep.subr.bf16.mxu1 %v3543_v26 }
 0xcb9   : > { %v1934_v38 = vpop.f32.mrb[28].mxu1 }
 0xcba   : > { %v3249_v58 = vpop.f32.mrb[29].mxu1 }
 0xcbb   : > { %v1937_v39 = vpop.f32.mrb[30].mxu1  ;;  %v3521_v58 = vld [vmem:[%s4550_s18 + $0x4] ss:$8 sps:$4 sm:$0xff]  }
 0xcbc   : > { %v3469_v40 = vpack.i.bf16 %v1937_v39, %v1934_v38  ;;  %v3250_v43 = vpop.f32.mrb[31].mxu1  ;;  %v3519_v38 = vld [vmem:[%s4550_s18] ss:$8 sps:$4 sm:$0xff]   ;;  %v3524_v39 = vld [vmem:[%s4550_s18 + $0x14] ss:$8 sps:$4 sm:$0xff]   ;;  %2340 = vmatprep.subr.bf16.mxu0 %v3521_v58 }
 0xcbd   : > { %2341 = vmatpush1.bf16.msra.mxu0 %v3519_v38 }
 0xcbe   : > { %3470 = vrot.lane.b32.xlu0 %v3469_v40, %s4055_s12  ;;  %v3522_v40 = vld [vmem:[%s4550_s18 + $0x10] ss:$8 sps:$4 sm:$0xff]   ;;  %2342 = vmatprep.subr.bf16.mxu0 %v3524_v39 }
 0xcc1   : > { %2343 = vmatpush1.bf16.msra.mxu0 %v3522_v40 }
 0xcc8   : > { %v1981_v49 = vpop.f32.mrb[40].mxu0 }
 0xcc9   : > { %v3255_v50 = vpop.f32.mrb[41].mxu0 }
 0xcca   : > { %v1984_v52 = vpop.f32.mrb[42].mxu0 }
 0xccb   : > { %v3474_v54 = vpack.i.bf16 %v1984_v52, %v1981_v49  ;;  %v3256_v56 = vpop.f32.mrb[43].mxu0 }
 0xccd   : > { %3475 = vrot.lane.b32.xlu1 %v3474_v54, %s4055_s12 }
 0xd30   : > { %v3471_v3 = vpop.permute.xlu0 %3470 }
 0xd31   : > { %v3473_v4 = vunpack.i.h.bf16 %v3471_v3  ;;  %v3472_v7 = vunpack.i.l.bf16 %v3471_v3 }
 0xd33   : > { %v2046_v13 = vsel %vm2045_vm7, %v2041_v8, %v3472_v7  ;;  %v2047_v10 = vsel %vm2045_vm7, %v2042_v9, %v3473_v4  ;;  %v3527_v4 = vld [vmem:[%s4550_s18 + $0x24] ss:$8 sps:$4 sm:$0xff]   ;;  %v3525_v7 = vld [vmem:[%s4550_s18 + $0x20] ss:$8 sps:$4 sm:$0xff]   ;;  %v3530_v8 = vld [vmem:[%s4550_s18 + $0x34] ss:$8 sps:$4 sm:$0xff]  }
 0xd34   : > { %v2050_v53 = vpack.c.bf16 %v2047_v10, %v2046_v13  ;;  %2344 = vmatprep.subr.bf16.mxu0 %v3527_v4  ;;  %v3528_v9 = vld [vmem:[%s4550_s18 + $0x30] ss:$8 sps:$4 sm:$0xff]   ;;  %v3533_v13 = vld [vmem:[%s4550_s18 + $0x44] ss:$8 sps:$4 sm:$0xff]   ;;  %v3531_v10 = vld [vmem:[%s4550_s18 + $0x40] ss:$8 sps:$4 sm:$0xff]  }
 0xd35   : > { %2345 = vmatpush1.bf16.msra.mxu0 %v3525_v7  ;;  %v2254_v4 = vsub.s32 4, %v4596_v44 }
 0xd36   : > { %3273 = vmatprep.mubr.bf16.mxu1 %v2050_v53  ;;  %2346 = vmatprep.subr.bf16.mxu0 %v3530_v8  ;;  %v3534_v53 = vld [vmem:[%s4550_s18 + $0x50] ss:$8 sps:$4 sm:$0xff]   ;;  %v3660_v8 = vld [vmem:[%s4558_s26 + $0x8] sm:$0xff] }
 0xd37   : > { %v2255_v7 = vrot.slane %v4855_v23, %v2254_v4 }
 0xd39   : > { %2347 = vmatpush1.bf16.msra.mxu0 %v3528_v9  ;;  %v2259_v9 = vrot.slane %v3660_v8, %v2254_v4 }
 0xd3a   : > { %2348 = vmatprep.subr.bf16.mxu0 %v3533_v13 }
 0xd3d   : > { %2349 = vmatpush1.bf16.msra.mxu0 %v3531_v10 }
 0xd3e   : > { %2350 = vmatprep.subr.bf16.mxu0 %v3536_v14 }
 0xd3f   : > { %v3476_v28 = vpop.permute.xlu1 %3475 }
 0xd40   : > { %v3478_v16 = vunpack.i.h.bf16 %v3476_v28  ;;  %v3477_v17 = vunpack.i.l.bf16 %v3476_v28  ;;  %v3544_v28 = vld [vmem:[%s4556_s24] sm:$0xff]  }
 0xd41   : > { %2351 = vmatpush1.bf16.msra.mxu0 %v3534_v53 }
 0xd42   : > { %v2049_v47 = vsel %vm2045_vm7, %v2044_v46, %v3478_v16  ;;  %v2048_v19 = vsel %vm2045_vm7, %v2043_v41, %v3477_v17  ;;  %2352 = vmatprep.subr.bf16.mxu0 %v3539_v11 }
 0xd43   : > { %v2051_v20 = vpack.c.bf16 %v2049_v47, %v2048_v19 }
 0xd45   : > { %3274 = vmatmul.mubr.bf16.vlgmr.msra.gmra.mrb[32].mxu1 %v2051_v20  ;;  %2353 = vmatpush1.bf16.msra.mxu0 %v3537_v51 }
 0xd46   : > { %2354 = vmatprep.subr.bf16.mxu0 %v3542_v45  ;;  %3106 = vmatpush3.bf16.msra.mxu1 %v3544_v28 }
 0xd47   : > { %3107 = vmatprep.subr.bf16.mxu1 %v3545_v29 }
 0xd49   : > { %2355 = vmatpush1.bf16.msra.mxu0 %v3540_v15 }
 0xd4a   : > { %3108 = vmatpush3.bf16.msra.mxu1 %v3546_v12 }
 0xe18   : > { %v3275_v24 = vpop.f32.mrb[32].mxu1 }
 0xe19   : > { %v2154_v55 = vpop.f32.mrb[33].mxu1  ;;  %v2163_v27 = vadd.f32 %v3275_v24, %v2071_v62 }
 0xe1a   : > { %v2155_v42 = vadd.f32 %v2154_v55, %v2071_v62  ;;  %v3276_v25 = vpop.f32.mrb[34].mxu1 }
 0xe1b   : > { %v2157_v59 = vpop.f32.mrb[35].mxu1  ;;  %v2166_v34 = vadd.f32 %v3276_v25, %v2071_v62  ;;  %v2171_v36 = vadd.f32 %v3658_v35, %v2163_v27  ;;  %v2228_v27 = vsub.s32 3, %v4596_v44 }
 0xe1c   : > { %v2158_v30 = vadd.f32 %v2157_v59, %v2071_v62  ;;  %v2169_v32 = vadd.f32 %v3656_v31, %v2155_v42  ;;  %v2220_v42 = vsub.s32 2, %v4596_v44 }
 0xe1d   : > { %v2172_v5 = vadd.f32 %v3659_v37, %v2166_v34  ;;  %v2229_v34 = vrot.slane %v4855_v23, %v2228_v27 }
 0xe1e   : > { %2173 = vadd.xlane.f32.xlu0 %v2169_v32  ;;  %v2170_v33 = vadd.f32 %v3657_v6, %v2158_v30  ;;  %v2221_v59 = vrot.slane %v4855_v23, %v2220_v42 }
 0xe20   : > { %2175 = vadd.xlane.f32.xlu1 %v2170_v33 }
 0xe22   : > { %2177 = vadd.xlane.f32.xlu0 %v2171_v36 }
 0xe26   : > { %2179 = vadd.xlane.f32.xlu0 %v2172_v5 }
 0xeab   : > { %v2174_v43 = vpop.xlane.xlu0 %2173 }
 0xeac   : > { %v2182_v48 = vmul.f32 0.0078125, %v2174_v43 }
 0xead   : > { %v2176_v49 = vpop.xlane.xlu1 %2175 }
 0xeae   : > { %v4862_v50 = vsub.f32 %v2169_v32, %v2182_v48  ;;  %v2183_v52 = vmul.f32 0.0078125, %v2176_v49 }
 0xeaf   : > { %v2178_v54 = vpop.xlane.xlu0 %2177 }
 0xeb0   : > { %v4864_v56 = vsub.f32 %v2170_v33, %v2183_v52  ;;  %v2184_v57 = vmul.f32 0.0078125, %v2178_v54  ;;  %v2190_v60 = vmul.f32 %v4862_v50, %v4862_v50  ;;  %v3547_v54 = vld [vmem:[%s4556_s24 + $0x50] sm:$0xff]  }
 0xeb1   : > { %3109 = vmatprep.subr.bf16.mxu1 %v3547_v54 }
 0xeb2   : > { %v4868_v61 = vsub.f32 %v2171_v36, %v2184_v57  ;;  %2194 = vadd.xlane.f32.xlu0 %v2190_v60  ;;  %v2191_v63 = vmul.f32 %v4864_v56, %v4864_v56  ;;  %v3549_v57 = vld [vmem:[%s4556_s24 + $0x58] sm:$0xff]  }
 0xeb3   : > { %v2180_v18 = vpop.xlane.xlu0 %2179  ;;  %v3550_v60 = vld [vmem:[%s4556_s24 + $0x18] sm:$0xff]  }
 0xeb4   : > { %v2185_v0 = vmul.f32 0.0078125, %v2180_v18  ;;  %2196 = vadd.xlane.f32.xlu1 %v2191_v63  ;;  %v2192_v1 = vmul.f32 %v4868_v61, %v4868_v61  ;;  %v3553_v63 = vld [vmem:[%s4556_s24 + $0x68] sm:$0xff]  }
 0xeb5   : > { %v3554_v18 = vld [vmem:[%s4556_s24 + $0x28] sm:$0xff]  }
 0xeb6   : > { %v4874_v2 = vsub.f32 %v2172_v5, %v2185_v0  ;;  %2198 = vadd.xlane.f32.xlu0 %v2192_v1  ;;  %v3555_v0 = vld [vmem:[%s4556_s24 + $0x70] sm:$0xff]  }
 0xeb7   : > { %v3556_v1 = vld [vmem:[%s4556_s24 + $0x30] sm:$0xff]  }
 0xeb8   : > { %v2193_v3 = vmul.f32 %v4874_v2, %v4874_v2 }
 0xeba   : > { %2200 = vadd.xlane.f32.xlu1 %v2193_v3  ;;  %v3558_v3 = vld [vmem:[%s4556_s24 + $0x38] sm:$0xff]  }
 0xf3f   : > { %v2195_v16 = vpop.xlane.xlu0 %2194 }
 0xf40   : > { %v2202_v17 = vmul.f32 0.0078125, %v2195_v16 }
 0xf41   : > { %v2197_v41 = vpop.xlane.xlu1 %2196 }
 0xf42   : > { %v2206_v46 = vadd.f32 1e-05, %v2202_v17  ;;  %v2203_v47 = vmul.f32 0.0078125, %v2197_v41 }
 0xf43   : > { %v2199_v19 = vpop.xlane.xlu0 %2198 }
 0xf44   : > { %3623 = vrsqrt.f32 %v2206_v46  ;;  %v2207_v20 = vadd.f32 1e-05, %v2203_v47  ;;  %v2204_v22 = vmul.f32 0.0078125, %v2199_v19 }
 0xf46   : > { %3625 = vrsqrt.f32 %v2207_v20  ;;  %v2208_v62 = vadd.f32 1e-05, %v2204_v22 }
 0xf47   : > { %v2201_v24 = vpop.xlane.xlu1 %2200 }
 0xf48   : > { %3627 = vrsqrt.f32 %v2208_v62  ;;  %v2205_v55 = vmul.f32 0.0078125, %v2201_v24 }
 0xf4a   : > { %v2209_v25 = vadd.f32 1e-05, %v2205_v55 }
 0xf4c   : > { %3629 = vrsqrt.f32 %v2209_v25 }
 0xf4e   : > { %v3624_v30 = vpop.eup %3623 }
 0xf4f   : > { %v2214_v31 = vmul.f32 %v3624_v30, %v4862_v50 }
 0xf50   : > { %v3626_v32 = vpop.eup %3625 }
 0xf51   : > { %v2215_v6 = vmul.f32 %v3626_v32, %v4864_v56  ;;  %v2222_v33 = vmul.f32 %v2221_v59, %v2214_v31  ;;  %v3548_v56 = vld [vmem:[%s4556_s24 + $0x10] sm:$0xff]  }
 0xf52   : > { %v3628_v35 = vpop.eup %3627  ;;  %3110 = vmatpush3.bf16.msra.mxu1 %v3548_v56 }
 0xf53   : > { %v2223_v36 = vmul.f32 %v2221_v59, %v2215_v6  ;;  %v4900_v37 = vadd.f32 %v2229_v34, %v2222_v33  ;;  %v2216_v38 = vmul.f32 %v3628_v35, %v4868_v61  ;;  %3111 = vmatprep.subr.bf16.mxu1 %v3549_v57  ;;  %v3552_v61 = vld [vmem:[%s4556_s24 + $0x20] sm:$0xff]  }
 0xf55   : > { %v4902_v5 = vadd.f32 %v2229_v34, %v2223_v36  ;;  %v2224_v43 = vmul.f32 %v2221_v59, %v2216_v38 }
 0xf56   : > { %v3630_v58 = vpop.eup %3629  ;;  %3112 = vmatpush3.bf16.msra.mxu1 %v3550_v60 }
 0xf57   : > { %v2234_v39 = vpack.c.bf16 %v4902_v5, %v4900_v37  ;;  %v2217_v40 = vmul.f32 %v3630_v58, %v4874_v2  ;;  %v4911_v50 = vadd.f32 %v2229_v34, %v2224_v43  ;;  %v3557_v2 = vld [vmem:[%s4556_s24 + $0x78] sm:$0xff]  }
 0xf59   : > { %2373 = vmatmul.mubr.bf16.vlgmr.msra.gmra.mrb[44].mxu0 %v2234_v39  ;;  %v2225_v48 = vmul.f32 %v2221_v59, %v2217_v40 }
 0xf5a   : > { %2382 = vmatprep.mubr.bf16.mxu0 %v4051_v21  ;;  %v3551_v21 = vld [vmem:[%s4556_s24 + $0x60] sm:$0xff]  }
 0xf5b   : > { %v4909_v49 = vadd.f32 %v2229_v34, %v2225_v48  ;;  %3113 = vmatprep.subr.bf16.mxu1 %v3551_v21 }
 0xf5c   : > { %3114 = vmatpush3.bf16.msra.mxu1 %v3552_v61 }
 0xf5d   : > { %v2235_v52 = vpack.c.bf16 %v4909_v49, %v4911_v50  ;;  %3115 = vmatprep.subr.bf16.mxu1 %v3553_v63 }
 0xf60   : > { %3116 = vmatpush3.bf16.msra.mxu1 %v3554_v18 }
 0xf61   : > { %2383 = vmatmul.mubr.bf16.gmra.mrb[48].mxu0 %v2235_v52  ;;  %3117 = vmatprep.subr.bf16.mxu1 %v3555_v0 }
 0xf64   : > { %3118 = vmatpush3.bf16.msra.mxu1 %v3556_v1 }
 0xf65   : > { %3119 = vmatprep.subr.bf16.mxu1 %v3557_v2 }
 0xf68   : > { %3120 = vmatpush3.bf16.msra.mxu1 %v3558_v3 }
0x102c   : > { %v2374_v13 = vpop.f32.mrb[44].mxu0 }
0x102d   : > { %v2375_v10 = vadd.f32 %v2374_v13, %v2255_v7  ;;  %v2376_v14 = vpop.f32.mrb[45].mxu0 }
0x102e   : > { %v2377_v53 = vadd.f32 %v2376_v14, %v2259_v9  ;;  %v2378_v11 = vpop.f32.mrb[46].mxu0  ;;  %v2471_v14 = vsub.s32 5, %v4596_v44 }
0x102f   : > { %v2401_v51 = vmul.f32 0.70710677, %v2375_v10  ;;  %v2379_v45 = vadd.f32 %v2378_v11, %v2255_v7  ;;  %v2380_v15 = vpop.f32.mrb[47].mxu0  ;;  %v2393_v6 = vmul.f32 0.5, %v2375_v10 }
0x1030   : > { %v2402_v26 = vmul.f32 0.70710677, %v2377_v53  ;;  %v2381_v28 = vadd.f32 %v2380_v15, %v2259_v9  ;;  %v2394_v35 = vmul.f32 0.5, %v2377_v53  ;;  %v2472_v11 = vrot.slane %v4855_v23, %v2471_v14 }
0x1031   : > { %3631 = verf.f32 %v2401_v51  ;;  %v2403_v29 = vmul.f32 0.70710677, %v2379_v45  ;;  %v2395_v33 = vmul.f32 0.5, %v2379_v45 }
0x1032   : > { %3633 = verf.f32 %v2402_v26  ;;  %v2404_v12 = vmul.f32 0.70710677, %v2381_v28  ;;  %v2396_v36 = vmul.f32 0.5, %v2381_v28 }
0x1033   : > { %3635 = verf.f32 %v2403_v29 }
0x1034   : > { %3637 = verf.f32 %v2404_v12  ;;  %v2384_v16 = vpop.f32.mrb[48].mxu0 }
0x1035   : > { %v2385_v17 = vadd.f32 %v2384_v16, %v2255_v7  ;;  %v2386_v41 = vpop.f32.mrb[49].mxu0 }
0x1036   : > { %v2387_v46 = vadd.f32 %v2386_v41, %v2259_v9  ;;  %v2388_v47 = vpop.f32.mrb[50].mxu0 }
0x1037   : > { %v2405_v19 = vmul.f32 0.70710677, %v2385_v17  ;;  %v2389_v20 = vadd.f32 %v2388_v47, %v2255_v7  ;;  %v2390_v22 = vpop.f32.mrb[51].mxu0  ;;  %v2397_v63 = vmul.f32 0.5, %v2385_v17 }
0x1038   : > { %v2406_v62 = vmul.f32 0.70710677, %v2387_v46  ;;  %v2391_v24 = vadd.f32 %v2390_v22, %v2259_v9  ;;  %v2398_v1 = vmul.f32 0.5, %v2387_v46 }
0x1039   : > { %3639 = verf.f32 %v2405_v19  ;;  %v2407_v55 = vmul.f32 0.70710677, %v2389_v20  ;;  %v2399_v18 = vmul.f32 0.5, %v2389_v20 }
0x103a   : > { %3641 = verf.f32 %v2406_v62  ;;  %v2408_v42 = vmul.f32 0.70710677, %v2391_v24  ;;  %v2400_v2 = vmul.f32 0.5, %v2391_v24 }
0x103b   : > { %v3632_v25 = vpop.eup %3631  ;;  %3643 = verf.f32 %v2407_v55 }
0x103c   : > { %v3634_v59 = vpop.eup %3633  ;;  %v2417_v27 = vadd.f32 1.0, %v3632_v25  ;;  %3645 = verf.f32 %v2408_v42 }
0x103d   : > { %v3636_v30 = vpop.eup %3635  ;;  %v2418_v31 = vadd.f32 1.0, %v3634_v59 }
0x103e   : > { %v3638_v32 = vpop.eup %3637  ;;  %v2419_v34 = vadd.f32 1.0, %v3636_v30  ;;  %v2425_v58 = vmul.f32 %v2417_v27, %v2393_v6 }
0x103f   : > { %v2420_v38 = vadd.f32 1.0, %v3638_v32  ;;  %v2426_v40 = vmul.f32 %v2418_v31, %v2394_v35 }
0x1040   : > { %v2427_v39 = vmul.f32 %v2419_v34, %v2395_v33 }
0x1041   : > { %v2428_v43 = vmul.f32 %v2420_v38, %v2396_v36 }
0x1042   : > { %v2433_v48 = vpack.c.bf16 %v2427_v39, %v2425_v58 }
0x1043   : > { %v3640_v52 = vpop.eup %3639  ;;  %v2434_v54 = vpack.c.bf16 %v2428_v43, %v2426_v40 }
0x1044   : > { %v3642_v56 = vpop.eup %3641  ;;  %v2421_v57 = vadd.f32 1.0, %v3640_v52 }
0x1045   : > { %v3644_v60 = vpop.eup %3643  ;;  %v2422_v21 = vadd.f32 1.0, %v3642_v56  ;;  %2601 = vmatprep.mubr.bf16.mxu1 %v2434_v54 }
0x1046   : > { %v3646_v61 = vpop.eup %3645  ;;  %v2423_v0 = vadd.f32 1.0, %v3644_v60  ;;  %2602 = vmatmul.mubr.bf16.vlgmr.msra.gmra.mrb[36].mxu1 %v2433_v48  ;;  %v2429_v4 = vmul.f32 %v2421_v57, %v2397_v63  ;;  %v2668_v57 = vsub.s32 6, %v4596_v44  ;;  %v2676_v63 = vsub.s32 7, %v4596_v44 }
0x1047   : > { %v2424_v3 = vadd.f32 1.0, %v3646_v61  ;;  %v2430_v8 = vmul.f32 %v2422_v21, %v2398_v1 }
0x1048   : > { %v2431_v7 = vmul.f32 %v2423_v0, %v2399_v18  ;;  %v2669_v0 = vrot.slane %v4855_v23, %v2668_v57 }
0x1049   : > { %v2432_v9 = vmul.f32 %v2424_v3, %v2400_v2  ;;  %v2677_v2 = vrot.slane %v4855_v23, %v2676_v63 }
0x104a   : > { %v2435_v13 = vpack.c.bf16 %v2431_v7, %v2429_v4 }
0x104b   : > { %v2436_v10 = vpack.c.bf16 %v2432_v9, %v2430_v8 }
0x104d   : > { %2609 = vmatprep.mubr.bf16.mxu1 %v2436_v10 }
0x104e   : > { %2610 = vmatmul.mubr.bf16.gmra.mrb[40].mxu1 %v2435_v13 }
0x1119   : > { %v3121_v53 = vpop.f32.mrb[36].mxu1 }
0x111a   : > { %v3122_v51 = vpop.f32.mrb[37].mxu1 }
0x111b   : > { %v3123_v45 = vadd.f32 %v3122_v51, %v3121_v53  ;;  %v3124_v15 = vpop.f32.mrb[38].mxu1 }
0x111c   : > { %v3125_v26 = vpop.f32.mrb[39].mxu1 }
0x111d   : > { %v2604_v28 = vadd.f32 %v3123_v45, %v2472_v11  ;;  %v3126_v29 = vadd.f32 %v3125_v26, %v3124_v15 }
0x111f   : > { %v2607_v12 = vadd.f32 %v3126_v29, %v2472_v11  ;;  %v2618_v16 = vadd.f32 %v2604_v28, %v4900_v37 }
0x1121   : > { %v3127_v17 = vpop.f32.mrb[40].mxu1  ;;  %2622 = vadd.xlane.f32.xlu0 %v2618_v16  ;;  %v2619_v41 = vadd.f32 %v2607_v12, %v4902_v5 }
0x1122   : > { %v3128_v46 = vpop.f32.mrb[41].mxu1 }
0x1123   : > { %v3129_v47 = vadd.f32 %v3128_v46, %v3127_v17  ;;  %v3130_v19 = vpop.f32.mrb[42].mxu1  ;;  %2624 = vadd.xlane.f32.xlu1 %v2619_v41 }
0x1124   : > { %v3131_v20 = vpop.f32.mrb[43].mxu1 }
0x1125   : > { %v2612_v22 = vadd.f32 %v3129_v47, %v2472_v11  ;;  %v3132_v62 = vadd.f32 %v3131_v20, %v3130_v19 }
0x1127   : > { %v2615_v24 = vadd.f32 %v3132_v62, %v2472_v11  ;;  %v2620_v55 = vadd.f32 %v2612_v22, %v4911_v50 }
0x1129   : > { %2626 = vadd.xlane.f32.xlu0 %v2620_v55  ;;  %v2621_v42 = vadd.f32 %v2615_v24, %v4909_v49 }
0x112b   : > { %2628 = vadd.xlane.f32.xlu1 %v2621_v42 }
0x11ae   : > { %v2623_v25 = vpop.xlane.xlu0 %2622 }
0x11af   : > { %v2630_v37 = vmul.f32 0.0078125, %v2623_v25 }
0x11b0   : > { %v2625_v59 = vpop.xlane.xlu1 %2624 }
0x11b1   : > { %v2634_v27 = vsub.f32 %v2618_v16, %v2630_v37  ;;  %v2631_v30 = vmul.f32 0.0078125, %v2625_v59 }
0x11b3   : > { %v2635_v5 = vsub.f32 %v2619_v41, %v2631_v30  ;;  %v2638_v31 = vmul.f32 %v2634_v27, %v2634_v27 }
0x11b5   : > { %2642 = vadd.xlane.f32.xlu0 %v2638_v31  ;;  %v2639_v32 = vmul.f32 %v2635_v5, %v2635_v5 }
0x11b6   : > { %v2627_v6 = vpop.xlane.xlu0 %2626 }
0x11b7   : > { %v2632_v33 = vmul.f32 0.0078125, %v2627_v6  ;;  %2644 = vadd.xlane.f32.xlu1 %v2639_v32 }
0x11b8   : > { %v2629_v34 = vpop.xlane.xlu1 %2628 }
0x11b9   : > { %v2636_v35 = vsub.f32 %v2620_v55, %v2632_v33  ;;  %v2633_v36 = vmul.f32 0.0078125, %v2629_v34 }
0x11bb   : > { %v2637_v50 = vsub.f32 %v2621_v42, %v2633_v36  ;;  %v2640_v38 = vmul.f32 %v2636_v35, %v2636_v35 }
0x11bd   : > { %2646 = vadd.xlane.f32.xlu0 %v2640_v38  ;;  %v2641_v49 = vmul.f32 %v2637_v50, %v2637_v50 }
0x11bf   : > { %2648 = vadd.xlane.f32.xlu1 %v2641_v49 }
0x1242   : > { %v2643_v58 = vpop.xlane.xlu0 %2642 }
0x1243   : > { %v2650_v39 = vmul.f32 0.0078125, %v2643_v58 }
0x1244   : > { %v2645_v40 = vpop.xlane.xlu1 %2644 }
0x1245   : > { %v2654_v43 = vadd.f32 1e-05, %v2650_v39  ;;  %v2651_v48 = vmul.f32 0.0078125, %v2645_v40 }
0x1247   : > { %3647 = vrsqrt.f32 %v2654_v43  ;;  %v2655_v52 = vadd.f32 1e-05, %v2651_v48 }
0x1249   : > { %3649 = vrsqrt.f32 %v2655_v52 }
0x124a   : > { %v2647_v54 = vpop.xlane.xlu0 %2646 }
0x124b   : > { %v2652_v56 = vmul.f32 0.0078125, %v2647_v54 }
0x124c   : > { %v2649_v60 = vpop.xlane.xlu1 %2648 }
0x124d   : > { %v2656_v21 = vadd.f32 1e-05, %v2652_v56  ;;  %v2653_v61 = vmul.f32 0.0078125, %v2649_v60 }
0x124f   : > { %3651 = vrsqrt.f32 %v2656_v21  ;;  %v2657_v18 = vadd.f32 1e-05, %v2653_v61 }
0x1251   : > { %v3648_v1 = vpop.eup %3647  ;;  %3653 = vrsqrt.f32 %v2657_v18 }
0x1252   : > { %v2662_v3 = vmul.f32 %v3648_v1, %v2634_v27 }
0x1253   : > { %v3650_v4 = vpop.eup %3649 }
0x1254   : > { %v2670_v7 = vmul.f32 %v2669_v0, %v2662_v3  ;;  %v2663_v8 = vmul.f32 %v3650_v4, %v2635_v5 }
0x1256   : > { %v2678_v9 = vadd.f32 %v2677_v2, %v2670_v7  ;;  %v2671_v13 = vmul.f32 %v2669_v0, %v2663_v8 }
0x1258   : > { %2682 = vst [vmem:[#allocation2] sm:$0xff] %v2678_v9  ;;  %v2679_v10 = vadd.f32 %v2677_v2, %v2671_v13  ;;  %2690 = vst [vmem:[%s4564_s1] sm:$0xff] (!%p3035_p9), %v2678_v9 }
0x1259   : > { %v3652_v14 = vpop.eup %3651 }
0x125a   : > { %2683 = vst [vmem:[#allocation2 + $0x8] sm:$0xff] %v2679_v10  ;;  %v2664_v53 = vmul.f32 %v3652_v14, %v2636_v35  ;;  %2691 = vst [vmem:[%s4564_s1 + $0x8] sm:$0xff] (!%p3035_p9), %v2679_v10 }
0x125b   : > { %v3654_v44 = vpop.eup %3653 }
0x125c   : > { %v2672_v11 = vmul.f32 %v2669_v0, %v2664_v53  ;;  %v2665_v51 = vmul.f32 %v3654_v44, %v2637_v50  ;;  %2689 = sbr.rel (%p3035_p9) target bundleno = 4707 (0x1263), region = 92 }
0x125e   : > { %v2680_v45 = vadd.f32 %v2677_v2, %v2672_v11  ;;  %v2673_v15 = vmul.f32 %v2669_v0, %v2665_v51 }
0x1260   : > { %2684 = vst [vmem:[#allocation2 + $0x10] sm:$0xff] %v2680_v45  ;;  %v2681_v26 = vadd.f32 %v2677_v2, %v2673_v15  ;;  %2692 = vst [vmem:[%s4564_s1 + $0x10] sm:$0xff] (!%p3035_p9), %v2680_v45 }
0x1262   : > { %2685 = vst [vmem:[#allocation2 + $0x18] sm:$0xff] %v2681_v26  ;;  %2693 = vst [vmem:[%s4564_s1 + $0x18] sm:$0xff] (!%p3035_p9), %v2681_v26 }
0x1263 PF: > { %s5124_s20 = sld [smem:[#allocation27_spill]]  ;;  %s5125_s23 = sld [smem:[#allocation33_spill]] }
0x1264   : > { %s5126_s19 = sld [smem:[#allocation41_spill]]  ;;  %s2709_s21 = sshll.u32 %s4564_s1, 4  ;;  %s4952_s21 = int_to_ptr.vmem [resolvable:$true] %s2709_s21 }
0x1265   : > { %s2695_s18 = scalar_lea.sflag [#allocation5], %s4526_s28  ;;  %s3897_s16 = scalar_lea.vmem %s4952_s21, 512 }
0x1266   : > { %p3898_p12 = scmp.ne.s32.totalorder %s4952_s21, %s3897_s16  ;;  %s4058_s24 = smov [#allocation17]  }
0x1267   : > { %s3901_s2 = sshll.u32 %s4058_s24, 4  ;;  %s3902_s2 = int_to_ptr.vmem [resolvable:$false] %s3901_s2 }
0x1268   : > { %s3903_s26 = scalar_lea.vmem %s3902_s2, 1024  ;;  %p3904_p5 = scmp.lt.s32.totalorder %s4952_s21, %s3902_s2 }
0x1269   : > { %s3048_s30 = sshll.u32 %s5124_s20, 9  ;;  %p5127_p3 = scmp.ne.s32.totalorder %s5125_s23, 0 }
0x126a   : > { %s4949_s17 = scalar_lea.hbm %s5126_s19, %s3048_s30  ;;  %p3905_p6 = scmp.lt.s32.totalorder %s3903_s26, %s3897_s16 }
0x126b   : > { %p3899_p13 = pnand %p3898_p12, %p5127_p3 }
0x126c   : > { %p3906_p11 = por %p3905_p6, %p3904_p5 }
0x126d   : > { %p3900_p7 = pneg %p3899_p13 }
0x126f   : > { %p3907_p4 = pnand %p3906_p11, %p3900_p7 }
0x1271   : > { %3910 = shalt.err (!%p3907_p4)
}
0x1272   : > { %s3911_s1 = scalar_lea.hbm %s4949_s17, 512  ;;  %s3915_s7 = scalar_lea.hbm %s5126_s19, 1024 }
0x1273   : > { %p3912_p8 = scmp.ne.s32.totalorder %s4949_s17, %s3911_s1  ;;  %p3916_p10 = scmp.lt.u32.totalorder %s4949_s17, %s5126_s19 }
0x1274   : > { %p3917_p0 = scmp.lt.u32.totalorder %s3915_s7, %s3911_s1  ;;  %p3919_p12 = scmp.lt.u32.totalorder %s3911_s1, %s4949_s17 }
0x1275   : > { %p3913_p2 = pnand %p3912_p8, %p5127_p3 }
0x1276   : > { %p3918_p9 = por %p3917_p0, %p3916_p10 }
0x1277   : > { %p3914_p1 = pneg %p3913_p2 }
0x1278   : > { %p3920_p13 = por %p3919_p12, %p3918_p9 }
0x127a   : > { %p3921_p7 = pnand %p3920_p13, %p3914_p1 }
0x127c   : > { %3924 = shalt.err (!%p3921_p7)
}
0x127d   : > { %s4059_s20 = smov 128   ;;  %s4060_s30 = smov 8  }
0x127e   : > { %3304 = dma.vmem_to_hbm [thread:$0]  (%p5127_p3), %s4952_s21, 512, %s4949_s17, %s2695_s18, %s4059_s20, %s4059_s20, %s4060_s30  }
0x127f PF: > { %s5128_s27 = sld [smem:[#allocation25_spill]]  ;;  %s5129_s3 = sld [smem:[#allocation30_spill]] }
0x1280   : > { %p3341_p5 = scmp.ge.s32.totalorder %s4035_s15, 2 }
0x1285   : > { %s2724_s16 = sand.u32 1, %s5128_s27   ;;  %p5130_p6 = scmp.ne.s32.totalorder %s5129_s3, 0 }
0x1286   : > { %s2725_s24 = scalar_lea.sflag [#allocation5], %s2724_s16 }
0x1287   : > { %p3333_p11 = pnand %p3341_p5, %p5130_p6 }
0x1289   : > { %3990 = dma.done.wait (!%p3333_p11), %s2725_s24, 512  }
0x128a   : > { %3992 = vsyncadd (!%p3333_p11), %s2725_s24, 4294966784  ;;  %s34_s15 = sadd.s32 1, %s4035_s15   ;;  %s5131_s27 = sld [smem:[#allocation24_spill]] }
0x128b   : > { %p31_p4 = scmp.ge.s32.totalorder %s34_s15, 6   ;;  %s5132_s23 = sld [smem:[#allocation32_spill]] }
0x128c   : > { %s5133_s17 = sld [smem:[#allocation34_spill]]  ;;  %s5134_s28 = smov %s4003_s29 }
0x128d   : > { %s5135_s29 = smov %s4381_s22  ;;  %s5136_s30 = smov %s4011_s9 }
0x128e   : > { %s5137_s9 = smov %s4015_s10  ;;  %s5138_s10 = smov %s4387_s8 }
0x128f   : > { %s5139_s11 = smov %s4027_s13  ;;  %s5140_s12 = smov %s4031_s14 }
0x1290   :  { %33 = sbr.rel (!%p31_p4) target bundleno = 24 (0x18), region = 174 }
0x1291   : > { %s5141_s13 = smov %s5132_s23 }
0x1292   : > { %s5142_s14 = smov %s5133_s17 }
0x1297   :  { %2730 = vsyncpa [#allocation4], 1 }
0x1298   :  { %2732 = vsyncpa [#allocation4 + $0x1], 1 }
0x1299   :  { %2733 = vsyncpa [#allocation7], 1 }
0x129a   :  { %2734 = vsyncpa [#allocation10], 1 }
0x129b   :  { %2736 = vsyncpa [#allocation10 + $0x1], 1 }
0x129c   :  { %2737 = vsyncpa [#allocation13], 1 }
0x129d   :  { %2739 = vsyncpa [#allocation13 + $0x1], 1 }
0x129e   :  { %2740 = vsyncpa [#allocation16], 1 }
0x129f   :  { %2742 = vsyncpa [#allocation16 + $0x1], 1 }
0x12a0   :  { %2743 = vsyncpa [#allocation5], 1 }
0x12a1   :  { %2745 = vsyncpa [#allocation5 + $0x1], 1 }

</bundles_post_ra>
